<compile_context>
chip_gen: v5e
topology: v5e:2x2
jax: 0.10.0
libtpu: 0.0.40
codegen_flags: <defaults>
</compile_context>

<pallas_src>
import functools
import math

import numpy as np
import jax
import jax.numpy as jnp
from jax import lax
from jax.experimental import pallas as pl
from jax.experimental.pallas import tpu as pltpu

FOV_DEG = 20.0          # geo.depth_2_point(depth, 20, ...)
EPS = 0.03              # geo.depth_2_point(depth, ..., 0.03)
TAN_HALF_FOV = math.tan(math.radians(FOV_DEG) / 2.0)
WIN = 11
SIGMA = 1.5
K1 = 0.01
K2 = 0.03


# -----------------------------------------------------------------------------
# Fused kernel: depth -> points -> rigid transform -> projection -> bilinear
# warp (two-stage gather) -> masking -> SSIM partial sum.  One grid step per
# batch element; every output block is per-b, so the grid axis is "parallel".
# -----------------------------------------------------------------------------
def fused_kernel(pose_ref, depth_ref, impT_ref, imx_ref,
                 foldA_ref, foldB_ref, gv_ref, ghtbd_ref,
                 geo_ref, masked_ref, ssim_ref, *, H, W):
    b = pl.program_id(0)
    HW = H * W
    Wo = W - WIN + 1
    fW, fH = float(W), float(H)

    # ---- prologue: per-output-pixel warp coordinates, flat (1, HW) -------------
    idx = lax.broadcasted_iota(jnp.int32, (1, HW), 1).astype(jnp.float32)
    vsrc = jnp.floor((idx + 0.5) * (1.0 / fW))          # output row (robust floor)
    usrc = idx - vsrc * fW                              # output col
    xn = (usrc + 0.5) * (2.0 / fW) - 1.0                # normalized coords [-1, 1]
    yn = (vsrc + 0.5) * (2.0 / fH) - 1.0

    z = jnp.maximum(depth_ref[0], EPS)                  # (1, HW)
    X = xn * TAN_HALF_FOV * z
    Y = yn * TAN_HALF_FOV * z

    p = pose_ref                                        # (B, 12) [R|t] in SMEM
    Xp = p[b, 0] * X + p[b, 1] * Y + p[b, 2] * z + p[b, 3]
    Yp = p[b, 4] * X + p[b, 5] * Y + p[b, 6] * z + p[b, 7]
    Zp = p[b, 8] * X + p[b, 9] * Y + p[b, 10] * z + p[b, 11]
    Zs = jnp.maximum(Zp, EPS)

    inv = 1.0 / (Zs * TAN_HALF_FOV)
    px = (Xp * inv + 1.0) * (fW * 0.5) - 0.5            # pixel coords (align_corners=False)
    py = (Yp * inv + 1.0) * (fH * 0.5) - 0.5
    # Clamp so int32 corner indices stay in a safe range; anything this far out of
    # bounds contributes zero (zeros padding) either way, so semantics are unchanged.
    px = jnp.clip(px, -2.0, fW + 1.0)
    py = jnp.clip(py, -2.0, fH + 1.0)

    x0f = jnp.floor(px)
    y0f = jnp.floor(py)
    wx = px - x0f
    wy = py - y0f
    x0 = x0f.astype(jnp.int32)
    y0 = y0f.astype(jnp.int32)
    x1 = x0 + 1
    y1 = y0 + 1

    # ---- two-stage bilinear gather --------------------------------------------
    # Stage 1 (MXU, bf16): gather the two source rows needed per output pixel.
    #   rows_k[x, i] = im_pred[y_k[i], x]   (0 if y_k[i] out of bounds: one-hot is empty)
    imgT = impT_ref[0].astype(jnp.bfloat16)                          # (W, H)
    row_iota = lax.broadcasted_iota(jnp.int32, (H, HW), 0)
    oh0 = jnp.where(row_iota == y0, 1.0, 0.0).astype(jnp.bfloat16)   # (H, HW)
    oh1 = jnp.where(row_iota == y1, 1.0, 0.0).astype(jnp.bfloat16)
    rows0 = jnp.dot(imgT, oh0, preferred_element_type=jnp.float32)   # (W, HW)
    rows1 = jnp.dot(imgT, oh1, preferred_element_type=jnp.float32)

    # Stage 2 (VPU + sublane reduce): pick the two columns with bilinear weights.
    # Out-of-range x never matches the iota, so no extra validity guards are needed.
    col_iota = lax.broadcasted_iota(jnp.int32, (W, HW), 0)
    m_x0 = col_iota == x0
    m_x1 = col_iota == x1
    cm0 = jnp.where(m_x0, (1.0 - wy) * (1.0 - wx), 0.0) \
        + jnp.where(m_x1, (1.0 - wy) * wx, 0.0)                      # (W, HW)
    cm1 = jnp.where(m_x0, wy * (1.0 - wx), 0.0) \
        + jnp.where(m_x1, wy * wx, 0.0)
    geo_flat = jnp.sum(rows0 * cm0 + rows1 * cm1,
                       axis=0, keepdims=True)                        # (1, HW)

    # ---- fold (1, HW) -> (H, W) with static 0/1 matrices (no in-kernel reshape) -
    tmp = foldA_ref[...] * geo_flat                                  # (H, HW)
    geo = jnp.dot(tmp, foldB_ref[...],
                  preferred_element_type=jnp.float32)                # (H, W)

    geo_ref[0] = geo
    masked = jnp.where(geo > 0.0, imx_ref[0], 0.0)                   # im_xfrmd.where(geo>0, 0)
    masked_ref[0] = masked

    # ---- SSIM (valid 11x11 separable Gaussian), per-batch partial sum ----------
    # ssim(255*x, 255*y, data_range=255) == ssim(x, y, data_range=1): the 255 scale
    # is folded into C1/C2 instead of scaling the images.
    x = masked
    y = geo
    big = jnp.concatenate([x, y, x * x, y * y, x * y], axis=1)       # (H, 5W)
    t = jnp.dot(gv_ref[...], big,
                preferred_element_type=jnp.float32)                  # (Ho, 5W)
    s = jnp.dot(t, ghtbd_ref[...],
                preferred_element_type=jnp.float32)                  # (Ho, 5Wo)

    mu1 = s[:, 0:Wo]
    mu2 = s[:, Wo:2 * Wo]
    ex2 = s[:, 2 * Wo:3 * Wo]
    ey2 = s[:, 3 * Wo:4 * Wo]
    exy = s[:, 4 * Wo:5 * Wo]

    mu1_sq = mu1 * mu1
    mu2_sq = mu2 * mu2
    mu12 = mu1 * mu2
    s1 = ex2 - mu1_sq
    s2 = ey2 - mu2_sq
    s12 = exy - mu12

    C1 = K1 * K1
    C2 = K2 * K2
    ssim_map = ((2.0 * mu12 + C1) * (2.0 * s12 + C2)) / (
        (mu1_sq + mu2_sq + C1) * (s1 + s2 + C2))
    ssim_ref[0] = jnp.sum(ssim_map, keepdims=True)                   # (1, 1) partial


# -----------------------------------------------------------------------------
# Glue (plain JAX / numpy): pose -> [R|t], static fold / Gaussian matrices.
# -----------------------------------------------------------------------------
def pose_to_flat_rt(pose):
    # pose: (B, 6) = [tx, ty, tz, rx, ry, rz];  R = Rz @ Ry @ Rx
    t = pose[:, :3]
    rx, ry, rz = pose[:, 3], pose[:, 4], pose[:, 5]
    cx, sx = jnp.cos(rx), jnp.sin(rx)
    cy, sy = jnp.cos(ry), jnp.sin(ry)
    cz, sz = jnp.cos(rz), jnp.sin(rz)
    r00 = cz * cy
    r01 = cz * sy * sx - sz * cx
    r02 = cz * sy * cx + sz * sx
    r10 = sz * cy
    r11 = sz * sy * sx + cz * cx
    r12 = sz * sy * cx - cz * sx
    r20 = -sy
    r21 = cy * sx
    r22 = cy * cx
    return jnp.stack([r00, r01, r02, t[:, 0],
                      r10, r11, r12, t[:, 1],
                      r20, r21, r22, t[:, 2]], axis=1).astype(jnp.float32)


def _gaussian_1d(win, sigma):
    xs = np.arange(win, dtype=np.float64) - (win - 1) / 2.0
    g = np.exp(-(xs ** 2) / (2.0 * sigma ** 2))
    return (g / g.sum()).astype(np.float32)


def _band_matrix(n_out, n_in, g):
    m = np.zeros((n_out, n_in), np.float32)
    for i in range(n_out):
        m[i, i:i + len(g)] = g
    return m


def inductive_bias_loss(pose_xfrm, im_pred, im_xfrmd_pred, depth, intrinsics=None):
    # intrinsics is accepted but unused, exactly like the reference forward().
    B, C, H, W = im_pred.shape
    assert C == 1, "SSIM configured with channel=1"
    HW = H * W
    Ho, Wo = H - WIN + 1, W - WIN + 1

    pose_flat = pose_to_flat_rt(pose_xfrm)                             # (B, 12) -> SMEM
    depth_f = depth.reshape(B, 1, HW).astype(jnp.float32)              # (B, 1, HW)
    impT = jnp.swapaxes(im_pred.reshape(B, H, W).astype(jnp.float32),
                        1, 2)                                          # (B, W, H)
    imx = im_xfrmd_pred.reshape(B, H, W).astype(jnp.float32)           # (B, H, W)

    # Static fold matrices: geo[v, u] = sum_i foldA[v, i] * geo_flat[i] * foldB[i, u]
    i_idx = np.arange(HW)
    foldA = (i_idx[None, :] // W == np.arange(H)[:, None]).astype(np.float32)   # (H, HW)
    foldB = (i_idx[:, None] % W == np.arange(W)[None, :]).astype(np.float32)    # (HW, W)

    # Static separable-Gaussian band matrices; horizontal window block-diagonalized
    # so the five filtered images share two matmuls.
    g = _gaussian_1d(WIN, SIGMA)
    gv = _band_matrix(Ho, H, g)                                        # (Ho, H)
    ght = _band_matrix(Wo, W, g).T                                     # (W, Wo)
    ght_bd = np.zeros((5 * W, 5 * Wo), np.float32)
    for k in range(5):
        ght_bd[k * W:(k + 1) * W, k * Wo:(k + 1) * Wo] = ght

    geo, masked, ssim_part = pl.pallas_call(
        functools.partial(fused_kernel, H=H, W=W),
        out_shape=(jax.ShapeDtypeStruct((B, H, W), jnp.float32),
                   jax.ShapeDtypeStruct((B, H, W), jnp.float32),
                   jax.ShapeDtypeStruct((B, 1, 1), jnp.float32)),
        grid=(B,),
        in_specs=[
            pl.BlockSpec(memory_space=pltpu.MemorySpace.SMEM),         # pose (B, 12)
            pl.BlockSpec((1, 1, HW), lambda b: (b, 0, 0)),             # depth
            pl.BlockSpec((1, W, H), lambda b: (b, 0, 0)),              # im_pred^T
            pl.BlockSpec((1, H, W), lambda b: (b, 0, 0)),              # im_xfrmd_pred
            pl.BlockSpec((H, HW), lambda b: (0, 0)),                   # foldA
            pl.BlockSpec((HW, W), lambda b: (0, 0)),                   # foldB
            pl.BlockSpec((Ho, H), lambda b: (0, 0)),                   # gv
            pl.BlockSpec((5 * W, 5 * Wo), lambda b: (0, 0)),           # ght block-diag
        ],
        out_specs=(pl.BlockSpec((1, H, W), lambda b: (b, 0, 0)),
                   pl.BlockSpec((1, H, W), lambda b: (b, 0, 0)),
                   pl.BlockSpec((1, 1, 1), lambda b: (b, 0, 0))),
        compiler_params=pltpu.CompilerParams(
            dimension_semantics=("parallel",)),
    )(pose_flat, depth_f, impT, imx,
      jnp.asarray(foldA), jnp.asarray(foldB),
      jnp.asarray(gv), jnp.asarray(ght_bd))

    # Epilogue (O(B) scalars): mean SSIM over batch/channel/valid window, exp(-ssim).
    ssim_val = jnp.sum(ssim_part) / float(B * C * Ho * Wo)
    loss = jnp.exp(-ssim_val)

    im_pred_geo = geo.reshape(B, 1, H, W)
    im_xfrmd_masked = masked.reshape(B, 1, H, W)
    return loss, im_pred_geo, im_xfrmd_masked


if __name__ == "__main__":
    key = jax.random.PRNGKey(0)
    k1, k2, k3, k4, k5 = jax.random.split(key, 5)

    B, C, H, W = 2, 1, 16, 16
    depth = jax.random.uniform(k1, (B, C, H, W), minval=0.5, maxval=4.0)
    im_pred = jax.random.uniform(k2, (B, C, H, W))
    im_xfrmd_pred = jax.random.uniform(k3, (B, C, H, W))
    pose_xfrm = jnp.concatenate(
        [0.10 * jax.random.normal(k4, (B, 3)),      # translation
         0.05 * jax.random.normal(k5, (B, 3))],     # euler angles (rad)
        axis=-1)
    intrinsics = jnp.tile(jnp.eye(3, dtype=jnp.float32)[None], (B, 1, 1))  # unused

    out = inductive_bias_loss(pose_xfrm, im_pred, im_xfrmd_pred, depth, intrinsics)
    jax.block_until_ready(out)
    loss, im_pred_geo, im_xfrmd_masked = out
    assert loss.shape == () and im_pred_geo.shape == (B, C, H, W) \
        and im_xfrmd_masked.shape == (B, C, H, W)
    assert bool(jnp.isfinite(loss))
    print("KERNEL_OK")
</pallas_src>

<mosaic_0001>
module attributes {stable_mosaic.version = 11 : i64} {
  func.func @fused_kernel(%arg0: i32, %arg1: memref<2x12xf32, #tpu.memory_space<smem>>, %arg2: memref<1x1x256xf32, #tpu.memory_space<vmem>>, %arg3: memref<1x16x16xf32, #tpu.memory_space<vmem>>, %arg4: memref<1x16x16xf32, #tpu.memory_space<vmem>>, %arg5: memref<16x256xf32, #tpu.memory_space<vmem>>, %arg6: memref<256x16xf32, #tpu.memory_space<vmem>>, %arg7: memref<6x16xf32, #tpu.memory_space<vmem>>, %arg8: memref<80x30xf32, #tpu.memory_space<vmem>>, %arg9: memref<1x16x16xf32, #tpu.memory_space<vmem>>, %arg10: memref<1x16x16xf32, #tpu.memory_space<vmem>>, %arg11: memref<1x1x1xf32, #tpu.memory_space<vmem>>) attributes {dimension_semantics = [#tpu.dimension_semantics<parallel>], iteration_bounds = array<i64: 2>, scalar_prefetch = 0 : i64, scratch_operands = 0 : i64, tpu.core_type = #tpu.core_type<tc>, window_params = [{transform_indices = @transform_0, window_bounds = array<i64: 2, 12>}, {transform_indices = @transform_1, window_bounds = array<i64: 1, 1, 256>}, {transform_indices = @transform_2, window_bounds = array<i64: 1, 16, 16>}, {transform_indices = @transform_3, window_bounds = array<i64: 1, 16, 16>}, {pipeline_mode = #tpu.pipeline_mode<synchronous>, transform_indices = @transform_4, window_bounds = array<i64: 16, 256>}, {pipeline_mode = #tpu.pipeline_mode<synchronous>, transform_indices = @transform_5, window_bounds = array<i64: 256, 16>}, {pipeline_mode = #tpu.pipeline_mode<synchronous>, transform_indices = @transform_6, window_bounds = array<i64: 6, 16>}, {pipeline_mode = #tpu.pipeline_mode<synchronous>, transform_indices = @transform_7, window_bounds = array<i64: 80, 30>}, {transform_indices = @transform_8, window_bounds = array<i64: 1, 16, 16>}, {transform_indices = @transform_9, window_bounds = array<i64: 1, 16, 16>}, {transform_indices = @transform_10, window_bounds = array<i64: 1, 1, 1>}]} {
    %0 = tpu.iota {dimensions = array<i32: 1>} : vector<1x256xi32>
    %1 = arith.sitofp %0 : vector<1x256xi32> to vector<1x256xf32>
    %cst = arith.constant 5.000000e-01 : f32
    %2 = vector.broadcast %cst : f32 to vector<1x256xf32>
    %3 = arith.addf %1, %2 : vector<1x256xf32>
    %cst_0 = arith.constant 6.250000e-02 : f32
    %4 = vector.broadcast %cst_0 : f32 to vector<1x256xf32>
    %5 = arith.mulf %3, %4 : vector<1x256xf32>
    %6 = math.floor %5 : vector<1x256xf32>
    %cst_1 = arith.constant 1.600000e+01 : f32
    %7 = vector.broadcast %cst_1 : f32 to vector<1x256xf32>
    %8 = arith.mulf %6, %7 : vector<1x256xf32>
    %9 = arith.subf %1, %8 : vector<1x256xf32>
    %cst_2 = arith.constant 5.000000e-01 : f32
    %10 = vector.broadcast %cst_2 : f32 to vector<1x256xf32>
    %11 = arith.addf %9, %10 : vector<1x256xf32>
    %cst_3 = arith.constant 1.250000e-01 : f32
    %12 = vector.broadcast %cst_3 : f32 to vector<1x256xf32>
    %13 = arith.mulf %11, %12 : vector<1x256xf32>
    %cst_4 = arith.constant 1.000000e+00 : f32
    %14 = vector.broadcast %cst_4 : f32 to vector<1x256xf32>
    %15 = arith.subf %13, %14 : vector<1x256xf32>
    %cst_5 = arith.constant 5.000000e-01 : f32
    %16 = vector.broadcast %cst_5 : f32 to vector<1x256xf32>
    %17 = arith.addf %6, %16 : vector<1x256xf32>
    %cst_6 = arith.constant 1.250000e-01 : f32
    %18 = vector.broadcast %cst_6 : f32 to vector<1x256xf32>
    %19 = arith.mulf %17, %18 : vector<1x256xf32>
    %cst_7 = arith.constant 1.000000e+00 : f32
    %20 = vector.broadcast %cst_7 : f32 to vector<1x256xf32>
    %21 = arith.subf %19, %20 : vector<1x256xf32>
    %c0 = arith.constant 0 : index
    %c0_8 = arith.constant 0 : index
    %c0_9 = arith.constant 0 : index
    %22 = vector.load %arg2[%c0, %c0_8, %c0_9] : memref<1x1x256xf32, #tpu.memory_space<vmem>>, vector<1x1x256xf32>
    %23 = vector.shape_cast %22 : vector<1x1x256xf32> to vector<1x256xf32>
    %cst_10 = arith.constant 3.000000e-02 : f32
    %24 = vector.broadcast %cst_10 : f32 to vector<1x256xf32>
    %25 = arith.maximumf %23, %24 : vector<1x256xf32>
    %cst_11 = arith.constant 0.176326975 : f32
    %26 = vector.broadcast %cst_11 : f32 to vector<1x256xf32>
    %27 = arith.mulf %15, %26 : vector<1x256xf32>
    %28 = arith.mulf %27, %25 : vector<1x256xf32>
    %cst_12 = arith.constant 0.176326975 : f32
    %29 = vector.broadcast %cst_12 : f32 to vector<1x256xf32>
    %30 = arith.mulf %21, %29 : vector<1x256xf32>
    %31 = arith.mulf %30, %25 : vector<1x256xf32>
    %32 = arith.index_cast %arg0 : i32 to index
    %c0_13 = arith.constant 0 : index
    %33 = memref.load %arg1[%32, %c0_13] : memref<2x12xf32, #tpu.memory_space<smem>>
    %34 = vector.broadcast %33 : f32 to vector<1x256xf32>
    %35 = arith.mulf %34, %28 : vector<1x256xf32>
    %36 = arith.index_cast %arg0 : i32 to index
    %c1 = arith.constant 1 : index
    %37 = memref.load %arg1[%36, %c1] : memref<2x12xf32, #tpu.memory_space<smem>>
    %38 = vector.broadcast %37 : f32 to vector<1x256xf32>
    %39 = arith.mulf %38, %31 : vector<1x256xf32>
    %40 = arith.addf %35, %39 : vector<1x256xf32>
    %41 = arith.index_cast %arg0 : i32 to index
    %c2 = arith.constant 2 : index
    %42 = memref.load %arg1[%41, %c2] : memref<2x12xf32, #tpu.memory_space<smem>>
    %43 = vector.broadcast %42 : f32 to vector<1x256xf32>
    %44 = arith.mulf %43, %25 : vector<1x256xf32>
    %45 = arith.addf %40, %44 : vector<1x256xf32>
    %46 = arith.index_cast %arg0 : i32 to index
    %c3 = arith.constant 3 : index
    %47 = memref.load %arg1[%46, %c3] : memref<2x12xf32, #tpu.memory_space<smem>>
    %48 = vector.broadcast %47 : f32 to vector<1x256xf32>
    %49 = arith.addf %45, %48 : vector<1x256xf32>
    %50 = arith.index_cast %arg0 : i32 to index
    %c4 = arith.constant 4 : index
    %51 = memref.load %arg1[%50, %c4] : memref<2x12xf32, #tpu.memory_space<smem>>
    %52 = vector.broadcast %51 : f32 to vector<1x256xf32>
    %53 = arith.mulf %52, %28 : vector<1x256xf32>
    %54 = arith.index_cast %arg0 : i32 to index
    %c5 = arith.constant 5 : index
    %55 = memref.load %arg1[%54, %c5] : memref<2x12xf32, #tpu.memory_space<smem>>
    %56 = vector.broadcast %55 : f32 to vector<1x256xf32>
    %57 = arith.mulf %56, %31 : vector<1x256xf32>
    %58 = arith.addf %53, %57 : vector<1x256xf32>
    %59 = arith.index_cast %arg0 : i32 to index
    %c6 = arith.constant 6 : index
    %60 = memref.load %arg1[%59, %c6] : memref<2x12xf32, #tpu.memory_space<smem>>
    %61 = vector.broadcast %60 : f32 to vector<1x256xf32>
    %62 = arith.mulf %61, %25 : vector<1x256xf32>
    %63 = arith.addf %58, %62 : vector<1x256xf32>
    %64 = arith.index_cast %arg0 : i32 to index
    %c7 = arith.constant 7 : index
    %65 = memref.load %arg1[%64, %c7] : memref<2x12xf32, #tpu.memory_space<smem>>
    %66 = vector.broadcast %65 : f32 to vector<1x256xf32>
    %67 = arith.addf %63, %66 : vector<1x256xf32>
    %68 = arith.index_cast %arg0 : i32 to index
    %c8 = arith.constant 8 : index
    %69 = memref.load %arg1[%68, %c8] : memref<2x12xf32, #tpu.memory_space<smem>>
    %70 = vector.broadcast %69 : f32 to vector<1x256xf32>
    %71 = arith.mulf %70, %28 : vector<1x256xf32>
    %72 = arith.index_cast %arg0 : i32 to index
    %c9 = arith.constant 9 : index
    %73 = memref.load %arg1[%72, %c9] : memref<2x12xf32, #tpu.memory_space<smem>>
    %74 = vector.broadcast %73 : f32 to vector<1x256xf32>
    %75 = arith.mulf %74, %31 : vector<1x256xf32>
    %76 = arith.addf %71, %75 : vector<1x256xf32>
    %77 = arith.index_cast %arg0 : i32 to index
    %c10 = arith.constant 10 : index
    %78 = memref.load %arg1[%77, %c10] : memref<2x12xf32, #tpu.memory_space<smem>>
    %79 = vector.broadcast %78 : f32 to vector<1x256xf32>
    %80 = arith.mulf %79, %25 : vector<1x256xf32>
    %81 = arith.addf %76, %80 : vector<1x256xf32>
    %82 = arith.index_cast %arg0 : i32 to index
    %c11 = arith.constant 11 : index
    %83 = memref.load %arg1[%82, %c11] : memref<2x12xf32, #tpu.memory_space<smem>>
    %84 = vector.broadcast %83 : f32 to vector<1x256xf32>
    %85 = arith.addf %81, %84 : vector<1x256xf32>
    %cst_14 = arith.constant 3.000000e-02 : f32
    %86 = vector.broadcast %cst_14 : f32 to vector<1x256xf32>
    %87 = arith.maximumf %85, %86 : vector<1x256xf32>
    %cst_15 = arith.constant 0.176326975 : f32
    %88 = vector.broadcast %cst_15 : f32 to vector<1x256xf32>
    %89 = arith.mulf %87, %88 : vector<1x256xf32>
    %cst_16 = arith.constant 1.000000e+00 : f32
    %90 = vector.broadcast %cst_16 : f32 to vector<1x256xf32>
    %91 = arith.divf %90, %89 : vector<1x256xf32>
    %92 = arith.mulf %49, %91 : vector<1x256xf32>
    %cst_17 = arith.constant 1.000000e+00 : f32
    %93 = vector.broadcast %cst_17 : f32 to vector<1x256xf32>
    %94 = arith.addf %92, %93 : vector<1x256xf32>
    %cst_18 = arith.constant 8.000000e+00 : f32
    %95 = vector.broadcast %cst_18 : f32 to vector<1x256xf32>
    %96 = arith.mulf %94, %95 : vector<1x256xf32>
    %cst_19 = arith.constant 5.000000e-01 : f32
    %97 = vector.broadcast %cst_19 : f32 to vector<1x256xf32>
    %98 = arith.subf %96, %97 : vector<1x256xf32>
    %99 = arith.mulf %67, %91 : vector<1x256xf32>
    %cst_20 = arith.constant 1.000000e+00 : f32
    %100 = vector.broadcast %cst_20 : f32 to vector<1x256xf32>
    %101 = arith.addf %99, %100 : vector<1x256xf32>
    %cst_21 = arith.constant 8.000000e+00 : f32
    %102 = vector.broadcast %cst_21 : f32 to vector<1x256xf32>
    %103 = arith.mulf %101, %102 : vector<1x256xf32>
    %cst_22 = arith.constant 5.000000e-01 : f32
    %104 = vector.broadcast %cst_22 : f32 to vector<1x256xf32>
    %105 = arith.subf %103, %104 : vector<1x256xf32>
    %cst_23 = arith.constant -2.000000e+00 : f32
    %cst_24 = arith.constant 1.700000e+01 : f32
    %106 = vector.broadcast %cst_23 : f32 to vector<1x256xf32>
    %107 = arith.maximumf %106, %98 : vector<1x256xf32>
    %108 = vector.broadcast %cst_24 : f32 to vector<1x256xf32>
    %109 = arith.minimumf %108, %107 : vector<1x256xf32>
    %cst_25 = arith.constant -2.000000e+00 : f32
    %cst_26 = arith.constant 1.700000e+01 : f32
    %110 = vector.broadcast %cst_25 : f32 to vector<1x256xf32>
    %111 = arith.maximumf %110, %105 : vector<1x256xf32>
    %112 = vector.broadcast %cst_26 : f32 to vector<1x256xf32>
    %113 = arith.minimumf %112, %111 : vector<1x256xf32>
    %114 = math.floor %109 : vector<1x256xf32>
    %115 = math.floor %113 : vector<1x256xf32>
    %116 = arith.subf %109, %114 : vector<1x256xf32>
    %117 = arith.subf %113, %115 : vector<1x256xf32>
    %118 = arith.fptosi %114 : vector<1x256xf32> to vector<1x256xi32>
    %119 = arith.fptosi %115 : vector<1x256xf32> to vector<1x256xi32>
    %c1_i32 = arith.constant 1 : i32
    %120 = vector.broadcast %c1_i32 : i32 to vector<1x256xi32>
    %121 = arith.addi %118, %120 : vector<1x256xi32>
    %c1_i32_27 = arith.constant 1 : i32
    %122 = vector.broadcast %c1_i32_27 : i32 to vector<1x256xi32>
    %123 = arith.addi %119, %122 : vector<1x256xi32>
    %c0_28 = arith.constant 0 : index
    %c0_29 = arith.constant 0 : index
    %c0_30 = arith.constant 0 : index
    %124 = vector.load %arg3[%c0_28, %c0_29, %c0_30] : memref<1x16x16xf32, #tpu.memory_space<vmem>>, vector<1x16x16xf32>
    %125 = vector.shape_cast %124 : vector<1x16x16xf32> to vector<16x16xf32>
    %126 = arith.truncf %125 : vector<16x16xf32> to vector<16x16xbf16>
    %127 = tpu.iota {dimensions = array<i32: 0>} : vector<16x256xi32>
    %128 = vector.broadcast %119 : vector<1x256xi32> to vector<16x256xi32>
    %129 = arith.cmpi eq, %127, %128 : vector<16x256xi32>
    %cst_31 = arith.constant 1.000000e+00 : f32
    %cst_32 = arith.constant 0.000000e+00 : f32
    %130 = vector.broadcast %cst_31 : f32 to vector<16x256xf32>
    %131 = vector.broadcast %cst_32 : f32 to vector<16x256xf32>
    %132 = arith.select %129, %130, %131 : vector<16x256xi1>, vector<16x256xf32>
    %133 = arith.truncf %132 : vector<16x256xf32> to vector<16x256xbf16>
    %134 = vector.broadcast %123 : vector<1x256xi32> to vector<16x256xi32>
    %135 = arith.cmpi eq, %127, %134 : vector<16x256xi32>
    %cst_33 = arith.constant 1.000000e+00 : f32
    %cst_34 = arith.constant 0.000000e+00 : f32
    %136 = vector.broadcast %cst_33 : f32 to vector<16x256xf32>
    %137 = vector.broadcast %cst_34 : f32 to vector<16x256xf32>
    %138 = arith.select %135, %136, %137 : vector<16x256xi1>, vector<16x256xf32>
    %139 = arith.truncf %138 : vector<16x256xf32> to vector<16x256xbf16>
    %cst_35 = arith.constant dense<0.000000e+00> : vector<16x256xf32>
    %140 = tpu.matmul %126, %133, %cst_35 {dimension_numbers = #tpu.dot_dimension_numbers<[1], [0], [0], [1], [0, 0, 1, 1], [], []>} : vector<16x16xbf16>, vector<16x256xbf16>, vector<16x256xf32> -> vector<16x256xf32>
    %cst_36 = arith.constant dense<0.000000e+00> : vector<16x256xf32>
    %141 = tpu.matmul %126, %139, %cst_36 {dimension_numbers = #tpu.dot_dimension_numbers<[1], [0], [0], [1], [0, 0, 1, 1], [], []>} : vector<16x16xbf16>, vector<16x256xbf16>, vector<16x256xf32> -> vector<16x256xf32>
    %142 = tpu.iota {dimensions = array<i32: 0>} : vector<16x256xi32>
    %143 = vector.broadcast %118 : vector<1x256xi32> to vector<16x256xi32>
    %144 = arith.cmpi eq, %142, %143 : vector<16x256xi32>
    %145 = vector.broadcast %121 : vector<1x256xi32> to vector<16x256xi32>
    %146 = arith.cmpi eq, %142, %145 : vector<16x256xi32>
    %cst_37 = arith.constant 1.000000e+00 : f32
    %147 = vector.broadcast %cst_37 : f32 to vector<1x256xf32>
    %148 = arith.subf %147, %117 : vector<1x256xf32>
    %cst_38 = arith.constant 1.000000e+00 : f32
    %149 = vector.broadcast %cst_38 : f32 to vector<1x256xf32>
    %150 = arith.subf %149, %116 : vector<1x256xf32>
    %151 = arith.mulf %148, %150 : vector<1x256xf32>
    %cst_39 = arith.constant 0.000000e+00 : f32
    %152 = vector.shape_cast %151 : vector<1x256xf32> to vector<1x256xf32>
    %153 = vector.broadcast %152 : vector<1x256xf32> to vector<16x256xf32>
    %154 = vector.broadcast %cst_39 : f32 to vector<16x256xf32>
    %155 = arith.select %144, %153, %154 : vector<16x256xi1>, vector<16x256xf32>
    %cst_40 = arith.constant 1.000000e+00 : f32
    %156 = vector.broadcast %cst_40 : f32 to vector<1x256xf32>
    %157 = arith.subf %156, %117 : vector<1x256xf32>
    %158 = arith.mulf %157, %116 : vector<1x256xf32>
    %cst_41 = arith.constant 0.000000e+00 : f32
    %159 = vector.shape_cast %158 : vector<1x256xf32> to vector<1x256xf32>
    %160 = vector.broadcast %159 : vector<1x256xf32> to vector<16x256xf32>
    %161 = vector.broadcast %cst_41 : f32 to vector<16x256xf32>
    %162 = arith.select %146, %160, %161 : vector<16x256xi1>, vector<16x256xf32>
    %163 = arith.addf %155, %162 : vector<16x256xf32>
    %cst_42 = arith.constant 1.000000e+00 : f32
    %164 = vector.broadcast %cst_42 : f32 to vector<1x256xf32>
    %165 = arith.subf %164, %116 : vector<1x256xf32>
    %166 = arith.mulf %117, %165 : vector<1x256xf32>
    %cst_43 = arith.constant 0.000000e+00 : f32
    %167 = vector.shape_cast %166 : vector<1x256xf32> to vector<1x256xf32>
    %168 = vector.broadcast %167 : vector<1x256xf32> to vector<16x256xf32>
    %169 = vector.broadcast %cst_43 : f32 to vector<16x256xf32>
    %170 = arith.select %144, %168, %169 : vector<16x256xi1>, vector<16x256xf32>
    %171 = arith.mulf %117, %116 : vector<1x256xf32>
    %cst_44 = arith.constant 0.000000e+00 : f32
    %172 = vector.shape_cast %171 : vector<1x256xf32> to vector<1x256xf32>
    %173 = vector.broadcast %172 : vector<1x256xf32> to vector<16x256xf32>
    %174 = vector.broadcast %cst_44 : f32 to vector<16x256xf32>
    %175 = arith.select %146, %173, %174 : vector<16x256xi1>, vector<16x256xf32>
    %176 = arith.addf %170, %175 : vector<16x256xf32>
    %177 = arith.mulf %140, %163 : vector<16x256xf32>
    %178 = arith.mulf %141, %176 : vector<16x256xf32>
    %179 = arith.addf %177, %178 : vector<16x256xf32>
    %cst_45 = arith.constant dense<0.000000e+00> : vector<256xf32>
    %180 = vector.multi_reduction <add>, %179, %cst_45 [0] : vector<16x256xf32> to vector<256xf32>
    %181 = vector.shape_cast %180 : vector<256xf32> to vector<1x256xf32>
    %c0_46 = arith.constant 0 : index
    %c0_47 = arith.constant 0 : index
    %182 = vector.load %arg5[%c0_46, %c0_47] : memref<16x256xf32, #tpu.memory_space<vmem>>, vector<16x256xf32>
    %183 = vector.broadcast %181 : vector<1x256xf32> to vector<16x256xf32>
    %184 = arith.mulf %182, %183 : vector<16x256xf32>
    %c0_48 = arith.constant 0 : index
    %c0_49 = arith.constant 0 : index
    %185 = vector.load %arg6[%c0_48, %c0_49] : memref<256x16xf32, #tpu.memory_space<vmem>>, vector<256x16xf32>
    %cst_50 = arith.constant dense<0.000000e+00> : vector<16x16xf32>
    %186 = tpu.matmul %184, %185, %cst_50 {dimension_numbers = #tpu.dot_dimension_numbers<[1], [0], [0], [1], [0, 0, 1, 1], [], []>} : vector<16x256xf32>, vector<256x16xf32>, vector<16x16xf32> -> vector<16x16xf32>
    %c0_51 = arith.constant 0 : index
    %c0_52 = arith.constant 0 : index
    %c0_53 = arith.constant 0 : index
    %187 = vector.load %arg9[%c0_51, %c0_52, %c0_53] : memref<1x16x16xf32, #tpu.memory_space<vmem>>, vector<1x16x16xf32>
    %188 = vector.shape_cast %187 : vector<1x16x16xf32> to vector<16x16xf32>
    %189 = vector.shape_cast %186 : vector<16x16xf32> to vector<1x16x16xf32>
    tpu.vector_store %arg9[%c0_51, %c0_52, %c0_53], %189 {strides = array<i32>} : memref<1x16x16xf32, #tpu.memory_space<vmem>>, vector<1x16x16xf32>,
    %cst_54 = arith.constant 0.000000e+00 : f32
    %190 = vector.broadcast %cst_54 : f32 to vector<16x16xf32>
    %191 = arith.cmpf ogt, %186, %190 : vector<16x16xf32>
    %c0_55 = arith.constant 0 : index
    %c0_56 = arith.constant 0 : index
    %c0_57 = arith.constant 0 : index
    %192 = vector.load %arg4[%c0_55, %c0_56, %c0_57] : memref<1x16x16xf32, #tpu.memory_space<vmem>>, vector<1x16x16xf32>
    %193 = vector.shape_cast %192 : vector<1x16x16xf32> to vector<16x16xf32>
    %cst_58 = arith.constant 0.000000e+00 : f32
    %194 = vector.broadcast %cst_58 : f32 to vector<16x16xf32>
    %195 = arith.select %191, %193, %194 : vector<16x16xi1>, vector<16x16xf32>
    %c0_59 = arith.constant 0 : index
    %c0_60 = arith.constant 0 : index
    %c0_61 = arith.constant 0 : index
    %196 = vector.load %arg10[%c0_59, %c0_60, %c0_61] : memref<1x16x16xf32, #tpu.memory_space<vmem>>, vector<1x16x16xf32>
    %197 = vector.shape_cast %196 : vector<1x16x16xf32> to vector<16x16xf32>
    %198 = vector.shape_cast %195 : vector<16x16xf32> to vector<1x16x16xf32>
    tpu.vector_store %arg10[%c0_59, %c0_60, %c0_61], %198 {strides = array<i32>} : memref<1x16x16xf32, #tpu.memory_space<vmem>>, vector<1x16x16xf32>,
    %199 = arith.mulf %195, %195 : vector<16x16xf32>
    %200 = arith.mulf %186, %186 : vector<16x16xf32>
    %201 = arith.mulf %195, %186 : vector<16x16xf32>
    %202 = tpu.concatenate %195, %186, %199, %200, %201 in 1 : vector<16x16xf32>, vector<16x16xf32>, vector<16x16xf32>, vector<16x16xf32>, vector<16x16xf32> -> vector<16x80xf32>
    %c0_62 = arith.constant 0 : index
    %c0_63 = arith.constant 0 : index
    %203 = vector.load %arg7[%c0_62, %c0_63] : memref<6x16xf32, #tpu.memory_space<vmem>>, vector<6x16xf32>
    %cst_64 = arith.constant dense<0.000000e+00> : vector<6x80xf32>
    %204 = tpu.matmul %203, %202, %cst_64 {dimension_numbers = #tpu.dot_dimension_numbers<[1], [0], [0], [1], [0, 0, 1, 1], [], []>} : vector<6x16xf32>, vector<16x80xf32>, vector<6x80xf32> -> vector<6x80xf32>
    %c0_65 = arith.constant 0 : index
    %c0_66 = arith.constant 0 : index
    %205 = vector.load %arg8[%c0_65, %c0_66] : memref<80x30xf32, #tpu.memory_space<vmem>>, vector<80x30xf32>
    %cst_67 = arith.constant dense<0.000000e+00> : vector<6x30xf32>
    %206 = tpu.matmul %204, %205, %cst_67 {dimension_numbers = #tpu.dot_dimension_numbers<[1], [0], [0], [1], [0, 0, 1, 1], [], []>} : vector<6x80xf32>, vector<80x30xf32>, vector<6x30xf32> -> vector<6x30xf32>
    %207 = vector.extract_strided_slice %206 {offsets = [0, 0], sizes = [6, 6], strides = [1, 1]} : vector<6x30xf32> to vector<6x6xf32>
    %208 = vector.extract_strided_slice %206 {offsets = [0, 6], sizes = [6, 6], strides = [1, 1]} : vector<6x30xf32> to vector<6x6xf32>
    %209 = vector.extract_strided_slice %206 {offsets = [0, 12], sizes = [6, 6], strides = [1, 1]} : vector<6x30xf32> to vector<6x6xf32>
    %210 = vector.extract_strided_slice %206 {offsets = [0, 18], sizes = [6, 6], strides = [1, 1]} : vector<6x30xf32> to vector<6x6xf32>
    %211 = vector.extract_strided_slice %206 {offsets = [0, 24], sizes = [6, 6], strides = [1, 1]} : vector<6x30xf32> to vector<6x6xf32>
    %212 = arith.mulf %207, %207 : vector<6x6xf32>
    %213 = arith.mulf %208, %208 : vector<6x6xf32>
    %214 = arith.mulf %207, %208 : vector<6x6xf32>
    %215 = arith.subf %209, %212 : vector<6x6xf32>
    %216 = arith.subf %210, %213 : vector<6x6xf32>
    %217 = arith.subf %211, %214 : vector<6x6xf32>
    %cst_68 = arith.constant 2.000000e+00 : f32
    %218 = vector.broadcast %cst_68 : f32 to vector<6x6xf32>
    %219 = arith.mulf %218, %214 : vector<6x6xf32>
    %cst_69 = arith.constant 9.99999974E-5 : f32
    %220 = vector.broadcast %cst_69 : f32 to vector<6x6xf32>
    %221 = arith.addf %219, %220 : vector<6x6xf32>
    %cst_70 = arith.constant 2.000000e+00 : f32
    %222 = vector.broadcast %cst_70 : f32 to vector<6x6xf32>
    %223 = arith.mulf %222, %217 : vector<6x6xf32>
    %cst_71 = arith.constant 8.99999984E-4 : f32
    %224 = vector.broadcast %cst_71 : f32 to vector<6x6xf32>
    %225 = arith.addf %223, %224 : vector<6x6xf32>
    %226 = arith.mulf %221, %225 : vector<6x6xf32>
    %227 = arith.addf %212, %213 : vector<6x6xf32>
    %cst_72 = arith.constant 9.99999974E-5 : f32
    %228 = vector.broadcast %cst_72 : f32 to vector<6x6xf32>
    %229 = arith.addf %227, %228 : vector<6x6xf32>
    %230 = arith.addf %215, %216 : vector<6x6xf32>
    %cst_73 = arith.constant 8.99999984E-4 : f32
    %231 = vector.broadcast %cst_73 : f32 to vector<6x6xf32>
    %232 = arith.addf %230, %231 : vector<6x6xf32>
    %233 = arith.mulf %229, %232 : vector<6x6xf32>
    %234 = arith.divf %226, %233 : vector<6x6xf32>
    %235 = vector.shape_cast %234 : vector<6x6xf32> to vector<1x6x6xf32>
    %cst_74 = arith.constant dense<0.000000e+00> : vector<1xf32>
    %236 = vector.multi_reduction <add>, %235, %cst_74 [1, 2] : vector<1x6x6xf32> to vector<1xf32>
    %237 = vector.shape_cast %236 : vector<1xf32> to vector<1x1x1xf32>
    %238 = vector.extract %237[0, 0, 0] : f32 from vector<1x1x1xf32>
    %239 = vector.broadcast %238 : f32 to vector<1x1xf32>
    %c0_75 = arith.constant 0 : index
    %c0_76 = arith.constant 0 : index
    %c0_77 = arith.constant 0 : index
    %240 = vector.load %arg11[%c0_75, %c0_76, %c0_77] : memref<1x1x1xf32, #tpu.memory_space<vmem>>, vector<1x1x1xf32>
    %241 = vector.shape_cast %240 : vector<1x1x1xf32> to vector<1x1xf32>
    %242 = vector.shape_cast %239 : vector<1x1xf32> to vector<1x1x1xf32>
    tpu.vector_store %arg11[%c0_75, %c0_76, %c0_77], %242 {strides = array<i32>} : memref<1x1x1xf32, #tpu.memory_space<vmem>>, vector<1x1x1xf32>,
    return
  }
  func.func @transform_0(%arg0: i32) -> (i32, i32) {
    %c0_i32 = arith.constant 0 : i32
    %c0_i32_0 = arith.constant 0 : i32
    %c0_i32_1 = arith.constant 0 : i32
    return %c0_i32, %c0_i32_0 : i32, i32
  }
  func.func @transform_1(%arg0: i32) -> (i32, i32, i32) {
    %c0_i32 = arith.constant 0 : i32
    %c0_i32_0 = arith.constant 0 : i32
    %c0_i32_1 = arith.constant 0 : i32
    return %arg0, %c0_i32, %c0_i32_0 : i32, i32, i32
  }
  func.func @transform_2(%arg0: i32) -> (i32, i32, i32) {
    %c0_i32 = arith.constant 0 : i32
    %c0_i32_0 = arith.constant 0 : i32
    %c0_i32_1 = arith.constant 0 : i32
    return %arg0, %c0_i32, %c0_i32_0 : i32, i32, i32
  }
  func.func @transform_3(%arg0: i32) -> (i32, i32, i32) {
    %c0_i32 = arith.constant 0 : i32
    %c0_i32_0 = arith.constant 0 : i32
    %c0_i32_1 = arith.constant 0 : i32
    return %arg0, %c0_i32, %c0_i32_0 : i32, i32, i32
  }
  func.func @transform_4(%arg0: i32) -> (i32, i32) {
    %c0_i32 = arith.constant 0 : i32
    %c0_i32_0 = arith.constant 0 : i32
    %c0_i32_1 = arith.constant 0 : i32
    return %c0_i32, %c0_i32_0 : i32, i32
  }
  func.func @transform_5(%arg0: i32) -> (i32, i32) {
    %c0_i32 = arith.constant 0 : i32
    %c0_i32_0 = arith.constant 0 : i32
    %c0_i32_1 = arith.constant 0 : i32
    return %c0_i32, %c0_i32_0 : i32, i32
  }
  func.func @transform_6(%arg0: i32) -> (i32, i32) {
    %c0_i32 = arith.constant 0 : i32
    %c0_i32_0 = arith.constant 0 : i32
    %c0_i32_1 = arith.constant 0 : i32
    return %c0_i32, %c0_i32_0 : i32, i32
  }
  func.func @transform_7(%arg0: i32) -> (i32, i32) {
    %c0_i32 = arith.constant 0 : i32
    %c0_i32_0 = arith.constant 0 : i32
    %c0_i32_1 = arith.constant 0 : i32
    return %c0_i32, %c0_i32_0 : i32, i32
  }
  func.func @transform_8(%arg0: i32) -> (i32, i32, i32) {
    %c0_i32 = arith.constant 0 : i32
    %c0_i32_0 = arith.constant 0 : i32
    %c0_i32_1 = arith.constant 0 : i32
    return %arg0, %c0_i32, %c0_i32_0 : i32, i32, i32
  }
  func.func @transform_9(%arg0: i32) -> (i32, i32, i32) {
    %c0_i32 = arith.constant 0 : i32
    %c0_i32_0 = arith.constant 0 : i32
    %c0_i32_1 = arith.constant 0 : i32
    return %arg0, %c0_i32, %c0_i32_0 : i32, i32, i32
  }
  func.func @transform_10(%arg0: i32) -> (i32, i32, i32) {
    %c0_i32 = arith.constant 0 : i32
    %c0_i32_0 = arith.constant 0 : i32
    %c0_i32_1 = arith.constant 0 : i32
    return %arg0, %c0_i32, %c0_i32_0 : i32, i32, i32
  }
}

</mosaic_0001>

<bundles_post_ra>
// kernel: tpu_custom_call.1
= control target key start
LH: loop header
LB: loop body
LE: loop exit
PB: predicated region body
PF: predicated region fallthrough
CT: control target
= control target key end

     0   :  { %s2067_s0 = inlined_call_operand.vmem [shape: f32[2,12], index: 0, kind: input, shape index: {}]   ;;  %s2068_s1 = inlined_call_operand.vmem [shape: f32[2,1,256], index: 1, kind: input, shape index: {}]   ;;  %s2069_s2 = inlined_call_operand.vmem [shape: f32[2,16,16], index: 2, kind: input, shape index: {}]   ;;  %s2070_s3 = inlined_call_operand.vmem [shape: f32[2,16,16], index: 3, kind: input, shape index: {}]   ;;  %s2071_s4 = inlined_call_operand.vmem [shape: f32[16,256], index: 4, kind: input, shape index: {}]   ;;  %s2072_s5 = inlined_call_operand.vmem [shape: f32[256,16], index: 5, kind: input, shape index: {}]   ;;  %s2073_s6 = inlined_call_operand.vmem [shape: f32[6,16], index: 6, kind: input, shape index: {}]   ;;  %s2074_s7 = inlined_call_operand.vmem [shape: f32[80,30], index: 7, kind: input, shape index: {}]   ;;  %s2075_s8 = inlined_call_operand.hbm [shape: f32[2,16,16], index: 8, kind: output, shape index: {0}]   ;;  %s2076_s9 = inlined_call_operand.hbm [shape: f32[2,16,16], index: 9, kind: output, shape index: {1}]   ;;  %s2077_s10 = inlined_call_operand.vmem [shape: f32[2,1,1], index: 10, kind: output, shape index: {2}]  }
   0x1   :  { %2078 = sst [smem:[#allocation11_spill]] %s2067_s0 }
   0x2   :  { %2079 = sst [smem:[#allocation12_spill]] %s2068_s1 }
   0x3   :  { %2080 = sst [smem:[#allocation13_spill]] %s2069_s2 }
   0x4   :  { %2081 = sst [smem:[#allocation14_spill]] %s2070_s3 }
   0x5   :  { %2082 = sst [smem:[#allocation15_spill]] %s2071_s4 }
   0x6   :  { %2083 = sst [smem:[#allocation16_spill]] %s2072_s5 }
   0x7   :  { %2084 = sst [smem:[#allocation17_spill]] %s2073_s6 }
   0x8   :  { %16 = vsyncpa [#allocation4], 0 }
   0x9   :  { %17 = vsyncpa [#allocation3], 0 }
   0xa   :  { %19 = vsyncpa [#allocation3 + $0x1], 0 }
   0xb   :  { %20 = vsyncpa [#allocation7], 0 }
   0xc   :  { %22 = vsyncpa [#allocation7 + $0x1], 0  ;;  %s1602_s13 = smov 0   ;;  %s1604_s14 = smov 0  }
   0xd   :  { %s1606_s15 = smov 0   ;;  %s1608_s16 = smov 0  }
   0xe LB: > { %s1623_s17 = sadd.s32 4294967295, %s1532_s16   ;;  %s1268_s18 = sadd.s32 4294967294, %s1532_s16   ;;  %s1532_s16 = sphi %s1608_s16, %s2113_s16   ;;  %s1528_s15 = sphi %s1606_s15, %s2112_s15   ;;  %s1524_s14 = sphi %s1604_s14, %s2111_s14   ;;  %s1520_s13 = sphi %s1602_s13, %s2110_s13  }
   0xf   : > { %s1627_s19 = sadd.s32 1, %s1532_s16   ;;  %s218_s20 = sadd.s32 1, %s1528_s15 }
  0x10   : > { %s215_s21 = ssub.s32 %s1532_s16, %s1627_s19  ;;  %p228_p0 = scmp.ne.s32.totalorder %s1528_s15, %s1524_s14 }
  0x11   : > { %p216_p1 = scmp.eq.s32.totalorder %s215_s21, 0  ;;  %p229_p2 = scmp.eq.s32.totalorder %s1623_s17, 1 }
  0x12   : > { %p234_p3 = scmp.ne.s32.totalorder %s1524_s14, %s1520_s13  ;;  %p235_p4 = scmp.eq.s32.totalorder %s1268_s18, 1 }
  0x13   : > { %s1638_s22 = scalar_select %p216_p1, %s1528_s15, %s218_s20  }
  0x14   : > { %p1640_p5 = por %p229_p2, %p228_p0  ;;  %p1644_p6 = por %p235_p4, %p234_p3 }
  0x15   : > { %p1269_p7 = scmp.ge.s32.totalorder %s1532_s16, 1  ;;  %p294_p8 = scmp.lt.s32.totalorder %s1532_s16, 3 }
  0x16   : > { %p1345_p9 = scmp.eq.s32.totalorder %s1623_s17, 0  ;;  %s2087_s0 = sld [smem:[#allocation11_spill]] }
  0x17   : > { %p295_p10 = pnand %p1269_p7, %p294_p8  ;;  %s1534_s28 = smov [#allocation2]  }
  0x19   : > { %p1334_p11 = pneg %p295_p10  ;;  %354 = sbr.rel (%p295_p10) target bundleno = 1354 (0x54a), region = 52 }
  0x1b   : > { %p1335_p12 = pnand %p1345_p9, %p1334_p11 }
  0x1c   : > { %s306_s27 = sshll.u32 %s2087_s0, 4  ;;  %s307_s27 = int_to_ptr.vmem [resolvable:$true] %s306_s27 }
  0x1d   : > { %1337 = dma.vmem_to_smem (!%p1335_p12), %s307_s27, 32, %s1534_s28, [#allocation4]  }
  0x1e   : > { %1507 = dma.done.wait (%p1345_p9), [#allocation4], 32  }
  0x1f   : > { %1509 = vsyncadd (%p1345_p9), [#allocation4], 4294967264 }
  0x20   : > { %361 = sfence }
  0x21   : > { %p411_p13 = scmp.lt.s32.totalorder %s1623_s17, 1  ;;  %v429_v0 = vlaneseq  ;;  %s1656_s29 = sshll.u32 %s1623_s17, 7  ;;  %vm659_vm11 = vcmask 130048  }
  0x22   : > { %s483_s11 = sadd.s32 2, %s1656_s29  ;;  %s2088_s1 = sld [smem:[#allocation12_spill]] }
  0x23   : > { %s1659_s30 = scalar_select %p411_p13, %s1623_s17, 1  ;;  %v430_v1 = vand.u32 127, %v429_v0 }
  0x24   : > { %s484_s18 = sld [smem:[#allocation2 + %s483_s11]]  ;;  %s476_s26 = sadd.s32 1, %s1656_s29 }
  0x25   : > { %s1276_s12 = sshll.u32 %s1659_s30, 1  ;;  %v432_v2 = vcvt.s32.f32 %v430_v1  ;;  %v431_v3 = vadd.s32 128, %v430_v1  ;;  %s1670_s27 = sld [smem:[#allocation2 + %s476_s26]] }
  0x26   : > { %s527_s28 = sadd.s32 8, %s1656_s29  ;;  %s532_s11 = sadd.s32 9, %s1656_s29 }
  0x27   : > { %v434_v4 = vadd.f32 0.5, %v432_v2  ;;  %v433_v6 = vcvt.s32.f32 %v431_v3  ;;  %s539_s20 = sadd.s32 10, %s1656_s29  ;;  %s494_s26 = sadd.s32 3, %s1656_s29 }
  0x28   : > { %s414_s25 = scalar_lea.vmem %s2088_s1, %s1276_s12  ;;  %s1677_s12 = sld [smem:[#allocation2 + %s532_s11]] }
  0x29   : > { %v456_v5 = vld [vmem:[%s414_s25] sm:$0x3]  ;;  %v436_v7 = vmul.f32 0.0625, %v434_v4  ;;  %v435_v8 = vadd.f32 0.5, %v433_v6  ;;  %s1680_s21 = sld [smem:[#allocation2 + %s539_s20]]  ;;  %s550_s11 = sadd.s32 11, %s1656_s29 }
  0x2a   : > { %v1668_v9 = vmax.f32 %v456_v5, 0.03  ;;  %v485_v11 = vstv %s484_s18  ;;  %s1683_s18 = sld [smem:[#allocation2 + %s1656_s29]]  ;;  %s504_s0 = sadd.s32 5, %s1656_s29 }
  0x2b   : > { %v438_v10 = vfloor.f32 %v436_v7  ;;  %v437_v12 = vmul.f32 0.0625, %v435_v8  ;;  %s1685_s25 = sld [smem:[#allocation2 + %s527_s28]]  ;;  %v478_v28 = vstv %s1670_s27  ;;  %s1544_s1 = smov 104  }
  0x2c   : > { %v1673_v13 = vmul.f32 %v485_v11, %v1668_v9  ;;  %v461_v23 = vperm.slane %v1668_v9, 0  ;;  %v462_v32 = vperm.slane %v1668_v9, 1  ;;  %s1693_s28 = sld [smem:[#allocation2 + %s494_s26]]  ;;  %s511_s26 = sadd.s32 6, %s1656_s29 }
  0x2d   : > { %v440_v14 = vmul.f32 16.0, %v438_v10  ;;  %v450_v15 = vadd.f32 0.5, %v438_v10  ;;  %v439_v16 = vfloor.f32 %v437_v12  ;;  %s1696_s20 = sld [smem:[#allocation2 + %s550_s11]] }
  0x2e   : > { %v534_v35 = vstv %s1677_s12  ;;  %v488_v49 = vperm.slane %v1673_v13, 0  ;;  %s1709_s11 = sld [smem:[#allocation2 + %s504_s0]]  ;;  %s522_s0 = sadd.s32 7, %s1656_s29 }
  0x2f   : > { %v442_v17 = vsub.f32 %v432_v2, %v440_v14  ;;  %v452_v18 = vmul.f32 0.125, %v450_v15  ;;  %v441_v19 = vmul.f32 16.0, %v439_v16  ;;  %v451_v20 = vadd.f32 0.5, %v439_v16  ;;  %s2089_s2 = sld [smem:[#allocation13_spill]] }
  0x30   : > { %v541_v29 = vstv %s1680_s21  ;;  %s499_s21 = sadd.s32 4, %s1656_s29  ;;  %v473_v41 = vstv %s1683_s18  ;;  %s512_s18 = sld [smem:[#allocation2 + %s511_s26]] }
  0x31   : > { %v444_v21 = vadd.f32 0.5, %v442_v17  ;;  %v1283_v22 = vadd.f32 -1.0, %v452_v18  ;;  %v443_v24 = vsub.f32 %v433_v6, %v441_v19  ;;  %v453_v25 = vmul.f32 0.125, %v451_v20  ;;  %s1706_s12 = sld [smem:[#allocation2 + %s499_s21]]  ;;  %s1312_s29 = sshll.u32 %s1659_s30, 4 }
  0x32   : > { %v542_v40 = vmul.f32 %v541_v29, %v1668_v9  ;;  %v529_v42 = vstv %s1685_s25  ;;  %v496_v56 = vstv %s1693_s28  ;;  %s1717_s25 = sld [smem:[#allocation2 + %s522_s0]]  ;;  %s1538_s21 = smov 32  }
  0x33   : > { %v446_v26 = vmul.f32 0.125, %v444_v21  ;;  %v467_v27 = vmul.f32 0.17632698, %v1283_v22  ;;  %v445_v30 = vadd.f32 0.5, %v443_v24  ;;  %v1284_v31 = vadd.f32 -1.0, %v453_v25  ;;  %s2106_s5 = sld [smem:[#allocation16_spill]] }
  0x34   : > { %v544_v51 = vperm.slane %v542_v40, 0  ;;  %v552_v57 = vstv %s1696_s20  ;;  %v545_v59 = vperm.slane %v542_v40, 1  ;;  %v506_v5 = vstv %s1709_s11  ;;  %s2107_s4 = sld [smem:[#allocation15_spill]]  ;;  %s1539_s26 = smov 64  }
  0x35   : > { %v1281_v33 = vadd.f32 -1.0, %v446_v26  ;;  %v469_v34 = vmul.f32 %v467_v27, %v461_v23  ;;  %v447_v36 = vmul.f32 0.125, %v445_v30  ;;  %v468_v37 = vmul.f32 0.17632698, %v1284_v31  ;;  %s419_s20 = scalar_lea.vmem %s2089_s2, %s1312_s29  ;;  %s2108_s3 = sld [smem:[#allocation14_spill]] }
  0x36   : > { %v513_v6 = vstv %s512_s18  ;;  %v489_v22 = vperm.slane %v1673_v13, 1  ;;  %s2109_s6 = sld [smem:[#allocation17_spill]]  ;;  %s1540_s0 = smov 12  }
  0x37   : > { %v458_v38 = vmul.f32 0.17632698, %v1281_v33  ;;  %v479_v39 = vmul.f32 %v478_v28, %v469_v34  ;;  %v1282_v43 = vadd.f32 -1.0, %v447_v36  ;;  %v470_v44 = vmul.f32 %v468_v37, %v462_v32  ;;  %s1314_s2 = sshll.u32 %s1623_s17, 4 }
  0x38   : > { %v535_v46 = vmul.f32 %v534_v35, %v469_v34  ;;  %v501_v4 = vstv %s1706_s12  ;;  %v507_v12 = vmul.f32 %v506_v5, %v469_v34  ;;  %v514_v14 = vmul.f32 %v513_v6, %v1668_v9  ;;  %s1959_s12 = sand.u32 1, %s1524_s14  }
  0x39   : > { %v465_v45 = vmul.f32 %v461_v23, %v458_v38  ;;  %v459_v47 = vmul.f32 0.17632698, %v1282_v43  ;;  %v536_v53 = vmul.f32 %v534_v35, %v470_v44  ;;  %v508_v17 = vmul.f32 %v506_v5, %v470_v44  ;;  %s1274_s11 = sshll.u32 %s1959_s12, 4 }
  0x3a   : > { %v516_v19 = vperm.slane %v514_v14, 0  ;;  %v480_v21 = vmul.f32 %v478_v28, %v470_v44  ;;  %v517_v25 = vperm.slane %v514_v14, 1  ;;  %v524_v34 = vstv %s1717_s25  ;;  %s1967_s27 = scalar_lea.vmem [#allocation5], %s1274_s11  ;;  %s1971_s28 = scalar_lea.vmem [#allocation6], %s1274_s11 }
  0x3b   : > { %v474_v48 = vmul.f32 %v473_v41, %v465_v45  ;;  %v530_v50 = vmul.f32 %v529_v42, %v465_v45  ;;  %v466_v52 = vmul.f32 %v462_v32, %v459_v47  ;;  %v502_v11 = vmul.f32 %v501_v4, %v465_v45  ;;  %s424_s25 = scalar_lea.vmem %s2108_s3, %s1312_s29  ;;  %s1536_s29 = smov 16  }
  0x3c   : > { %s1094_s11 = scalar_lea.hbm %s2075_s8, %s1314_s2 }
  0x3d   : > { %v481_v54 = vadd.f32 %v479_v39, %v474_v48  ;;  %v537_v55 = vadd.f32 %v535_v46, %v530_v50  ;;  %v531_v58 = vmul.f32 %v529_v42, %v466_v52  ;;  %v503_v16 = vmul.f32 %v501_v4, %v466_v52 }
  0x3e   : > { %v509_v18 = vadd.f32 %v507_v12, %v502_v11  ;;  %v475_v20 = vmul.f32 %v473_v41, %v466_v52 }
  0x3f   : > { %v492_v60 = vadd.f32 %v488_v49, %v481_v54  ;;  %v548_v61 = vadd.f32 %v544_v51, %v537_v55  ;;  %v538_v62 = vadd.f32 %v536_v53, %v531_v58  ;;  %v510_v24 = vadd.f32 %v508_v17, %v503_v16 }
  0x40   : > { %v482_v27 = vadd.f32 %v480_v21, %v475_v20  ;;  %v520_v29 = vadd.f32 %v516_v19, %v509_v18  ;;  %v1535_v19 = vmov 1.0|1.0  }
  0x41   : > { %v497_v63 = vadd.f32 %v496_v56, %v492_v60  ;;  %v553_v1 = vadd.f32 %v552_v57, %v548_v61  ;;  %v549_v2 = vadd.f32 %v545_v59, %v538_v62  ;;  %v521_v35 = vadd.f32 %v517_v25, %v510_v24 }
  0x42   : > { %v493_v33 = vadd.f32 %v489_v22, %v482_v27  ;;  %v525_v41 = vadd.f32 %v524_v34, %v520_v29 }
  0x43   : > { %v555_v3 = vmax.f32 %v553_v1, 0.03  ;;  %v554_v7 = vadd.f32 %v552_v57, %v549_v2  ;;  %v526_v47 = vadd.f32 %v524_v34, %v521_v35  ;;  %v1724_v1 = vshrl.u32 %v429_v0, 7  ;;  %v630_v0 = vld [vmem:[%s419_s20 + $0x8] sm:$0xff] }
  0x44   : > { %v498_v38 = vadd.f32 %v496_v56, %v493_v33 }
  0x45   : > { %v557_v8 = vmul.f32 0.17632698, %v555_v3  ;;  %v556_v10 = vmax.f32 %v554_v7, 0.03  ;;  %v1735_v6 = vadd.s32 8, %v1724_v1 }
  0x47   : > { %1413 = vrcp.f32 %v557_v8  ;;  %v558_v15 = vmul.f32 0.17632698, %v556_v10  ;;  %v570_v9 = vand.u32 2147483648, %v557_v8  ;;  %vm564_vm0 = vweird.f32 %v557_v8  ;;  %v629_v10 = vld [vmem:[%s419_s20] sm:$0xff]  ;;  %s1537_s20 = smov 48  }
  0x48   : > { %v568_v32 = vand.u32 2147483647, %v557_v8  ;;  %v631_v17 = vpack.c.bf16 %v630_v0, %v629_v10 }
  0x49   : > { %1415 = vrcp.f32 %v558_v15  ;;  %v571_v28 = vor.u32 1.1754944e-38, %v570_v9  ;;  %v585_v13 = vand.u32 2147483648, %v558_v15  ;;  %vm579_vm3 = vweird.f32 %v558_v15 }
  0x4a   : > { %v583_v40 = vand.u32 2147483647, %v558_v15  ;;  %vm569_vm5 = vcmp.eq.f32.partialorder %v568_v32, 8.507059e+37 }
  0x4b   : > { %v586_v45 = vor.u32 1.1754944e-38, %v585_v13 }
  0x4c   : > { %vm584_vm7 = vcmp.eq.f32.partialorder %v583_v40, 8.507059e+37 }
  0x4d   : > { %v1414_v23 = vpop.eup %1413 }
  0x4e   : > { %v560_v26 = vmul.f32 %v1414_v23, %v557_v8  ;;  %vm565_vm1 = vweird.f32 %v1414_v23 }
  0x4f   : > { %v1416_v30 = vpop.eup %1415  ;;  %vm566_vm2 = vmor %vm564_vm0, %vm565_vm1 }
  0x50   : > { %v561_v31 = vsub.f32 1.0, %v560_v26  ;;  %v575_v36 = vmul.f32 %v1416_v30, %v558_v15  ;;  %vm580_vm4 = vweird.f32 %v1416_v30 }
  0x51   : > { %vm581_vm6 = vmor %vm579_vm3, %vm580_vm4 }
  0x52   : > { %v562_v37 = vmul.f32 %v1414_v23, %v561_v31  ;;  %v576_v39 = vsub.f32 1.0, %v575_v36 }
  0x54   : > { %v563_v42 = vadd.f32 %v1414_v23, %v562_v37  ;;  %v577_v43 = vmul.f32 %v1416_v30, %v576_v39 }
  0x56   : > { %v567_v44 = vsel %vm566_vm2, %v1414_v23, %v563_v42  ;;  %v578_v48 = vadd.f32 %v1416_v30, %v577_v43 }
  0x57   : > { %v572_v46 = vsel %vm569_vm5, %v571_v28, %v567_v44 }
  0x58   : > { %v589_v49 = vmul.f32 %v572_v46, %v497_v63  ;;  %v597_v50 = vmul.f32 %v572_v46, %v525_v41  ;;  %v582_v51 = vsel %vm581_vm6, %v1416_v30, %v578_v48 }
  0x59   : > { %v587_v53 = vsel %vm584_vm7, %v586_v45, %v582_v51 }
  0x5a   : > { %v599_v52 = vadd.f32 1.0, %v597_v50  ;;  %v590_v54 = vmul.f32 %v587_v53, %v498_v38  ;;  %v598_v55 = vmul.f32 %v587_v53, %v526_v47  ;;  %v591_v21 = vadd.f32 1.0, %v589_v49  ;;  %v830_v53 = vld [vmem:[%s2106_s5 + $0xa8] sm:$0xff] }
  0x5c   : > { %v601_v56 = vmul.f32 8.0, %v599_v52  ;;  %v600_v57 = vadd.f32 1.0, %v598_v55  ;;  %v593_v22 = vmul.f32 8.0, %v591_v21  ;;  %v592_v25 = vadd.f32 1.0, %v590_v54  ;;  %v812_v54 = vld [vmem:[%s2106_s5 + $0x18] sm:$0xff]  ;;  %v829_v55 = vld [vmem:[%s2106_s5 + $0xa0] sm:$0xff] }
  0x5e   : > { %v1288_v58 = vadd.f32 -0.5, %v601_v56  ;;  %v602_v59 = vmul.f32 8.0, %v600_v57  ;;  %v1286_v23 = vadd.f32 -0.5, %v593_v22  ;;  %v594_v9 = vmul.f32 8.0, %v592_v25  ;;  %v840_v25 = vld [vmem:[%s2106_s5 + $0xf8] sm:$0xff]  ;;  %v811_v56 = vld [vmem:[%s2106_s5 + $0x10] sm:$0xff] }
  0x5f   : > { %864 = vmatpush.msra.mxu1 %v840_v25 }
  0x60   : > { %v609_v60 = vmax.f32 %v1288_v58, -2.0  ;;  %v1289_v61 = vadd.f32 -0.5, %v602_v59  ;;  %v605_v24 = vmax.f32 %v1286_v23, -2.0  ;;  %v1287_v27 = vadd.f32 -0.5, %v594_v9 }
  0x62   : > { %v611_v62 = vmin.f32 %v609_v60, 17.0  ;;  %v610_v2 = vmax.f32 %v1289_v61, -2.0  ;;  %v607_v26 = vmin.f32 %v605_v24, 17.0  ;;  %v606_v30 = vmax.f32 %v1287_v27, -2.0  ;;  %v823_v24 = vld [vmem:[%s2106_s5 + $0x70] sm:$0xff]  ;;  %v822_v27 = vld [vmem:[%s2106_s5 + $0x68] sm:$0xff] }
  0x64   : > { %v615_v63 = vfloor.f32 %v611_v62  ;;  %v612_v3 = vmin.f32 %v610_v2, 17.0  ;;  %v613_v29 = vfloor.f32 %v607_v26  ;;  %v608_v31 = vmin.f32 %v606_v30, 17.0  ;;  %v821_v30 = vld [vmem:[%s2106_s5 + $0x60] sm:$0xff]  ;;  %v826_v2 = vld [vmem:[%s2106_s5 + $0x88] sm:$0xff] }
  0x66   : > { %v1732_v4 = vsub.f32 %v611_v62, %v615_v63  ;;  %v1321_v5 = vcvt.f32.s32 %v615_v63  ;;  %v616_v7 = vfloor.f32 %v612_v3  ;;  %v1317_v32 = vcvt.f32.s32 %v613_v29 }
  0x67   : > { %v617_v33 = vsub.f32 %v607_v26, %v613_v29  ;;  %v614_v34 = vfloor.f32 %v608_v31  ;;  %v839_v29 = vld [vmem:[%s2106_s5 + $0xf0] sm:$0xff] }
  0x68   : > { %v635_v8 = vperm.slane %v1321_v5, 0  ;;  %v627_v11 = vadd.s32 1, %v1321_v5  ;;  %v1737_v12 = vsub.f32 %v612_v3, %v616_v7  ;;  %v1323_v14 = vcvt.f32.s32 %v616_v7  ;;  %865 = vmatpush.msra.mxu1 %v839_v29 }
  0x69   : > { %v618_v35 = vsub.f32 %v608_v31, %v614_v34  ;;  %v625_v36 = vadd.s32 1, %v1317_v32  ;;  %v1319_v37 = vcvt.f32.s32 %v614_v34  ;;  %v731_v28 = vsub.f32 1.0, %v1732_v4  ;;  %v838_v31 = vld [vmem:[%s2106_s5 + $0xe8] sm:$0xff] }
  0x6a   : > { %vm637_vm8 = vcmp.eq.s32.totalorder %v1724_v1, %v635_v8  ;;  %vm639_vm9 = vcmp.eq.s32.totalorder %v1735_v6, %v635_v8  ;;  %v647_v15 = vperm.slane %v627_v11, 0  ;;  %v636_v16 = vperm.slane %v1323_v14, 0  ;;  %866 = vmatpush.msra.mxu1 %v838_v31 }
  0x6b   : > { %vm1290_vm10 = vmpackc.low %vm639_vm9, %vm637_vm8  ;;  %v628_v18 = vadd.s32 1, %v1323_v14  ;;  %v733_v38 = vsub.f32 1.0, %v617_v33  ;;  %v732_v13 = vsub.f32 1.0, %v1737_v12  ;;  %v734_v39 = vsub.f32 1.0, %v618_v35 }
  0x6c   : > { %1291 = vmatpush.bf16.msk.msra.mxu2 %vm1290_vm10, %v1535_v19  ;;  %vm649_vm12 = vcmp.eq.s32.totalorder %v1724_v1, %v647_v15  ;;  %vm651_vm13 = vcmp.eq.s32.totalorder %v1735_v6, %v647_v15  ;;  %vm638_vm14 = vcmp.eq.s32.totalorder %v1724_v1, %v636_v16  ;;  %vm640_vm15 = vcmp.eq.s32.totalorder %v1735_v6, %v636_v16  ;;  %v824_v16 = vld [vmem:[%s2106_s5 + $0x78] sm:$0xff] }
  0x6d   : > { %vm1296_vm0 = vmpackc.low %vm651_vm13, %vm649_vm12  ;;  %v648_v20 = vperm.slane %v628_v18, 0  ;;  %v626_v40 = vadd.s32 1, %v1319_v37  ;;  %v735_v41 = vmul.f32 %v733_v38, %v731_v28  ;;  %v743_v42 = vmul.f32 %v731_v28, %v617_v33  ;;  %841 = vmatpush.msra.mxu0 %v824_v16  ;;  %v836_v28 = vld [vmem:[%s2106_s5 + $0xd8] sm:$0xff] }
  0x6e   : > { %vm1293_vm1 = vmpackc.low %vm640_vm15, %vm638_vm14  ;;  %v736_v43 = vmul.f32 %v734_v39, %v732_v13  ;;  %v744_v44 = vmul.f32 %v732_v13, %v618_v35  ;;  %v719_v45 = vperm.slane %v1317_v32, 0  ;;  %v725_v46 = vperm.slane %v625_v36, 0  ;;  %v820_v32 = vld [vmem:[%s2106_s5 + $0x58] sm:$0xff] }
  0x6f   : > { %1294 = vmatpush.bf16.msk.msra.mxu3 %vm1293_vm1, %v1535_v19  ;;  %1292 = vmatmul.msk.bf16.vlgmr.msra.gmra.mxu2 %vm659_vm11, %v631_v17  ;;  %vm650_vm2 = vcmp.eq.s32.totalorder %v1724_v1, %v648_v20  ;;  %vm652_vm3 = vcmp.eq.s32.totalorder %v1735_v6, %v648_v20  ;;  %v720_v47 = vperm.slane %v1319_v37, 0  ;;  %v726_v48 = vperm.slane %v626_v40, 0  ;;  %v819_v37 = vld [vmem:[%s2106_s5 + $0x50] sm:$0xff]  ;;  %v818_v40 = vld [vmem:[%s2106_s5 + $0x48] sm:$0xff] }
  0x70   : > { %1297 = vmatpush.bf16.msk.msrb.mxu2 %vm1296_vm0, %v1535_v19  ;;  %vm1299_vm4 = vmpackc.low %vm652_vm3, %vm650_vm2  ;;  %v737_v49 = vperm.slane %v735_v41, 0  ;;  %v745_v50 = vperm.slane %v743_v42, 0  ;;  %v738_v51 = vperm.slane %v736_v43, 0  ;;  %v746_v52 = vperm.slane %v744_v44, 0  ;;  %842 = vmatpush.msra.mxu0 %v823_v24  ;;  %v835_v41 = vld [vmem:[%s2106_s5 + $0xd0] sm:$0xff]  ;;  %v817_v42 = vld [vmem:[%s2106_s5 + $0x40] sm:$0xff] }
  0x71   : > { %vm1754_vm5 = vcmp.eq.s32.totalorder %v1724_v1, %v719_v45  ;;  %vm1759_vm6 = vcmp.eq.s32.totalorder %v1724_v1, %v725_v46  ;;  %vm1764_vm7 = vcmp.eq.s32.totalorder %v1724_v1, %v720_v47  ;;  %vm1769_vm8 = vcmp.eq.s32.totalorder %v1724_v1, %v726_v48  ;;  %v834_v43 = vld [vmem:[%s2106_s5 + $0xc8] sm:$0xff]  ;;  %v816_v44 = vld [vmem:[%s2106_s5 + $0x38] sm:$0xff]  ;;  %v809_v1 = vld [vmem:[%s2106_s5] sm:$0xff] }
  0x72   : > { %1295 = vmatmul.msk.bf16.vlgmr.msra.gmra.mxu3 %vm659_vm11, %v631_v17  ;;  %v739_v57 = vsel %vm1754_vm5, %v737_v49, 0.0  ;;  %v747_v58 = vsel %vm1759_vm6, %v745_v50, 0.0  ;;  %v740_v59 = vsel %vm1764_vm7, %v738_v51, 0.0  ;;  %v748_v60 = vsel %vm1769_vm8, %v746_v52, 0.0  ;;  %843 = vmatpush.msra.mxu0 %v822_v27 }
  0x73   : > { %1300 = vmatpush.bf16.msk.msrb.mxu3 %vm1299_vm4, %v1535_v19  ;;  %v1781_v61 = vadd.f32 %v747_v58, %v739_v57  ;;  %v1783_v62 = vadd.f32 %v748_v60, %v740_v59  ;;  %vm1786_vm9 = vcmp.eq.s32.totalorder %v1735_v6, %v719_v45  ;;  %vm1791_vm10 = vcmp.eq.s32.totalorder %v1735_v6, %v725_v46  ;;  %v833_v45 = vld [vmem:[%s2106_s5 + $0xc0] sm:$0xff]  ;;  %v828_v57 = vld [vmem:[%s2106_s5 + $0x98] sm:$0xff]  ;;  %v810_v59 = vld [vmem:[%s2106_s5 + $0x8] sm:$0xff] }
  0x74   : > { %v741_v63 = vsel %vm1786_vm9, %v737_v49, 0.0  ;;  %v749_v3 = vsel %vm1791_vm10, %v745_v50, 0.0  ;;  %vm1802_vm12 = vcmp.eq.s32.totalorder %v1735_v6, %v720_v47  ;;  %vm1807_vm13 = vcmp.eq.s32.totalorder %v1735_v6, %v726_v48  ;;  %844 = vmatpush.msra.mxu0 %v821_v30  ;;  %v815_v47 = vld [vmem:[%s2106_s5 + $0x30] sm:$0xff]  ;;  %v832_v48 = vld [vmem:[%s2106_s5 + $0xb8] sm:$0xff]  ;;  %v814_v49 = vld [vmem:[%s2106_s5 + $0x28] sm:$0xff] }
  0x75   : > { %v1799_v5 = vadd.f32 %v749_v3, %v741_v63  ;;  %v742_v10 = vsel %vm1802_vm12, %v738_v51, 0.0  ;;  %v750_v0 = vsel %vm1807_vm13, %v746_v52, 0.0  ;;  %v755_v14 = vmul.f32 %v733_v38, %v1732_v4  ;;  %v831_v50 = vld [vmem:[%s2106_s5 + $0xb0] sm:$0xff]  ;;  %v813_v52 = vld [vmem:[%s2106_s5 + $0x20] sm:$0xff] }
  0x76   : > { %v1815_v11 = vadd.f32 %v750_v0, %v742_v10  ;;  %v763_v15 = vmul.f32 %v1732_v4, %v617_v33  ;;  %v756_v18 = vmul.f32 %v734_v39, %v1737_v12  ;;  %v764_v19 = vmul.f32 %v1737_v12, %v618_v35  ;;  %v837_v33 = vld [vmem:[%s2106_s5 + $0xe0] sm:$0xff]  ;;  %845 = vmatpush.msra.mxu0 %v820_v32  ;;  %v827_v60 = vld [vmem:[%s2106_s5 + $0x90] sm:$0xff] }
  0x77   : > { %v757_v6 = vperm.slane %v755_v14, 0  ;;  %867 = vmatpush.msra.mxu1 %v837_v33  ;;  %v825_v3 = vld [vmem:[%s2106_s5 + $0x80] sm:$0xff]  ;;  %vm937_vm0 = vcmask 261120   ;;  %vm940_vm1 = vcmask 392192   ;;  %vm943_vm2 = vcmask 523264  }
  0x78   : > { %v758_v22 = vperm.slane %v756_v18, 0  ;;  %v766_v23 = vperm.slane %v764_v19, 0  ;;  %846 = vmatpush.msra.mxu0 %v819_v37  ;;  %v803_v37 = vld [vmem:[%s2107_s4 + $0x10] sm:$0xff]  ;;  %vm980_vm3 = vcmask 654336  }
  0x79   : > { %v759_v20 = vsel %vm1754_vm5, %v757_v6, 0.0  ;;  %v761_v34 = vsel %vm1786_vm9, %v757_v6, 0.0  ;;  %868 = vmatpush.msra.mxu1 %v836_v28 }
  0x7a   : > { %v760_v12 = vsel %vm1764_vm7, %v758_v22, 0.0  ;;  %v768_v26 = vsel %vm1769_vm8, %v766_v23, 0.0  ;;  %v762_v38 = vsel %vm1802_vm12, %v758_v22, 0.0  ;;  %v770_v13 = vsel %vm1807_vm13, %v766_v23, 0.0  ;;  %847 = vmatpush.msra.mxu0 %v818_v40 }
  0x7b   : > { %v1840_v9 = vadd.f32 %v768_v26, %v760_v12  ;;  %v774_v39 = vadd.f32 %v770_v13, %v762_v38  ;;  %869 = vmatpush.msra.mxu1 %v835_v41  ;;  %v804_v38 = vld [vmem:[%s2107_s4 + $0x18] sm:$0xff]  ;;  %vm1060_vm7 = vcmask 46080  }
  0x7c   : > { %848 = vmatpush.msra.mxu0 %v817_v42  ;;  %v891_v42 = vld [vmem:[%s424_s25] sm:$0xff] }
  0x7d   : > { %870 = vmatpush.msra.mxu1 %v834_v43 }
  0x7e   : > { %849 = vmatpush.msra.mxu0 %v816_v44 }
  0x7f   : > { %1298 = vmatmul.msk.bf16.vlgmr.msrb.gmra.mxu2 %vm659_vm11, %v631_v17  ;;  %871 = vmatpush.msra.mxu1 %v833_v45 }
  0x80   : > { %850 = vmatpush.msra.mxu0 %v815_v47  ;;  %v892_v47 = vld [vmem:[%s424_s25 + $0x8] sm:$0xff]  ;;  %s1541_s25 = smov 122  }
  0x81   : > { %872 = vmatpush.msra.mxu1 %v832_v48 }
  0x82   : > { %1301 = vmatmul.msk.bf16.vlgmr.msrb.gmra.mxu3 %vm659_vm11, %v631_v17  ;;  %v765_v17 = vperm.slane %v763_v15, 0  ;;  %851 = vmatpush.msra.mxu0 %v814_v49 }
  0x83   : > { %873 = vmatpush.msra.mxu1 %v831_v50 }
  0x84   : > { %v767_v21 = vsel %vm1759_vm6, %v765_v17, 0.0  ;;  %v769_v35 = vsel %vm1791_vm10, %v765_v17, 0.0  ;;  %852 = vmatpush.msra.mxu0 %v813_v52 }
  0x85   : > { %v1828_v4 = vadd.f32 %v767_v21, %v759_v20  ;;  %v1864_v36 = vadd.f32 %v769_v35, %v761_v34  ;;  %874 = vmatpush.msra.mxu1 %v830_v53  ;;  %v802_v34 = vld [vmem:[%s2107_s4 + $0x8] sm:$0xff] }
  0x86   : > { %853 = vmatpush.msra.mxu0 %v812_v54 }
  0x87   : > { %875 = vmatpush.msra.mxu1 %v829_v55 }
  0x88   : > { %854 = vmatpush.msra.mxu0 %v811_v56 }
  0x89   : > { %876 = vmatpush.msra.mxu1 %v828_v57 }
  0x8a   : > { %855 = vmatpush.msra.mxu0 %v810_v59  ;;  %v979_v59 = vld [vmem:[%s2074_s7 + $0x48] sm:$0xff] }
  0x8b   : > { %877 = vmatpush.msra.mxu1 %v827_v60  ;;  %v978_v60 = vld [vmem:[%s2074_s7 + $0x40] sm:$0xff]  ;;  %990 = vmatpush.msra.mxu3 %v979_v59 }
  0x8c   : > { %856 = vmatpush.msra.mxu0 %v809_v1  ;;  %v977_v1 = vld [vmem:[%s2074_s7 + $0x38] sm:$0xff] }
  0x8d   : > { %878 = vmatpush.msra.mxu1 %v826_v2  ;;  %991 = vmatpush.msra.mxu3 %v978_v60  ;;  %v976_v2 = vld [vmem:[%s2074_s7 + $0x30] sm:$0xff] }
  0x8f   : > { %879 = vmatpush.msra.mxu1 %v825_v3  ;;  %992 = vmatpush.msra.mxu3 %v977_v1  ;;  %v974_v3 = vld [vmem:[%s2074_s7 + $0x20] sm:$0xff] }
  0x91   : > { %993 = vmatpush.msra.mxu3 %v976_v2 }
  0xf2   : > { %v672_v46 = vpop.f32.mrf.mxu2 }
  0xf3   : > { %v775_v8 = vmul.f32 %v1781_v61, %v672_v46 }
  0xf5   : > { %v686_v51 = vpop.f32.mrf.mxu3 }
  0xf6   : > { %v776_v15 = vmul.f32 %v1783_v62, %v686_v51 }
  0xfa   : > { %v674_v58 = vpop.f32.mrf.mxu2 }
  0xfb   : > { %v777_v18 = vmul.f32 %v1799_v5, %v674_v58  ;;  %v801_v5 = vld [vmem:[%s2107_s4] sm:$0xff] }
  0xfd   : > { %v688_v63 = vpop.f32.mrf.mxu3 }
  0xfe   : > { %v778_v22 = vmul.f32 %v1815_v11, %v688_v63  ;;  %v975_v63 = vld [vmem:[%s2074_s7 + $0x28] sm:$0xff] }
  0xff   : > { %994 = vmatpush.msra.mxu3 %v975_v63 }
 0x101   : > { %995 = vmatpush.msra.mxu3 %v974_v3 }
 0x102   : > { %v700_v7 = vpop.f32.mrf.mxu2 }
 0x103   : > { %v779_v10 = vmul.f32 %v1828_v4, %v700_v7  ;;  %v973_v7 = vld [vmem:[%s2074_s7 + $0x18] sm:$0xff] }
 0x104   : > { %996 = vmatpush.msra.mxu3 %v973_v7 }
 0x105   : > { %v783_v0 = vadd.f32 %v779_v10, %v775_v8  ;;  %v714_v14 = vpop.f32.mrf.mxu3  ;;  %v972_v8 = vld [vmem:[%s2074_s7 + $0x10] sm:$0xff]  ;;  %v971_v10 = vld [vmem:[%s2074_s7 + $0x8] sm:$0xff] }
 0x106   : > { %v780_v16 = vmul.f32 %v1840_v9, %v714_v14  ;;  %997 = vmatpush.msra.mxu3 %v972_v8 }
 0x108   : > { %v784_v6 = vadd.f32 %v780_v16, %v776_v15  ;;  %998 = vmatpush.msra.mxu3 %v971_v10 }
 0x10a   : > { %v702_v17 = vpop.f32.mrf.mxu2 }
 0x10b   : > { %v781_v19 = vmul.f32 %v1864_v36, %v702_v17 }
 0x10d   : > { %v785_v20 = vadd.f32 %v781_v19, %v777_v18  ;;  %v716_v21 = vpop.f32.mrf.mxu3 }
 0x10e   : > { %v782_v23 = vmul.f32 %v774_v39, %v716_v21 }
 0x10f   : > { %v787_v61 = vadd.f32 %v785_v20, %v783_v0 }
 0x110   : > { %v786_v24 = vadd.f32 %v782_v23, %v778_v22 }
 0x111   : > { %v788_v4 = vrot.slane %v787_v61, 4 }
 0x112   : > { %v794_v25 = vadd.f32 %v786_v24, %v784_v6 }
 0x113   : > { %v789_v12 = vadd.f32 %v788_v4, %v787_v61 }
 0x114   : > { %v795_v26 = vrot.slane %v794_v25, 4 }
 0x115   : > { %v790_v62 = vrot.slane %v789_v12, 2 }
 0x116   : > { %v796_v27 = vadd.f32 %v795_v26, %v794_v25 }
 0x117   : > { %v791_v9 = vadd.f32 %v790_v62, %v789_v12 }
 0x118   : > { %v797_v29 = vrot.slane %v796_v27, 2 }
 0x119   : > { %v792_v30 = vrot.slane %v791_v9, 1 }
 0x11a   : > { %v798_v31 = vadd.f32 %v797_v29, %v796_v27  ;;  %v946_v27 = vld [vmem:[%s2109_s6] sm:$0x3f] }
 0x11b   : > { %v793_v32 = vadd.f32 %v792_v30, %v791_v9  ;;  %v970_v29 = vld [vmem:[%s2074_s7] sm:$0xff] }
 0x11c   : > { %v799_v11 = vrot.slane %v798_v31, 1  ;;  %999 = vmatpush.msra.mxu3 %v970_v29 }
 0x11d   : > { %v805_v33 = vmul.f32 %v801_v5, %v793_v32  ;;  %v807_v28 = vmul.f32 %v803_v37, %v793_v32 }
 0x11e   : > { %v800_v35 = vadd.f32 %v799_v11, %v798_v31 }
 0x11f   : > { %857 = vmatmul.f32.vlgmr.msra.gmra.mxu0 %v805_v33 }
 0x120   : > { %v806_v36 = vmul.f32 %v802_v34, %v800_v35  ;;  %v808_v13 = vmul.f32 %v804_v38, %v800_v35 }
 0x122   : > { %880 = vmatmul.f32.vlgmr.msra.gmra.mxu1 %v806_v36 }
 0x127   : > { %860 = vmatmul.f32.gmra.mxu0 %v807_v28 }
 0x12a   : > { %883 = vmatmul.f32.gmra.mxu1 %v808_v13 }
 0x19c   : > { %v858_v39 = vpop.f32.mrf.mxu0 }
 0x19f   : > { %v881_v40 = vpop.f32.mrf.mxu1 }
 0x1a0   : > { %v882_v41 = vadd.f32 %v881_v40, %v858_v39 }
 0x1a2   : > { %vm889_vm14 = vcmp.gt.f32.partialorder %v882_v41, 0.0  ;;  %887 = vst.msk [vmem:[%s1967_s27] sm:$0xff] %vm659_vm11, %v882_v41  ;;  %v899_v49 = vmul.f32 %v882_v41, %v882_v41 }
 0x1a3   : > { %v893_v43 = vsel %vm889_vm14, %v891_v42, 0.0 }
 0x1a4   : > { %895 = vst.msk [vmem:[%s1971_s28] sm:$0xff] %vm659_vm11, %v893_v43  ;;  %v861_v44 = vpop.f32.mrf.mxu0  ;;  %v897_v54 = vmul.f32 %v893_v43, %v893_v43  ;;  %v901_v57 = vmul.f32 %v893_v43, %v882_v41 }
 0x1a7   : > { %v884_v45 = vpop.f32.mrf.mxu1 }
 0x1a8   : > { %v885_v46 = vadd.f32 %v884_v45, %v861_v44 }
 0x1aa   : > { %v1393_v48 = vpack.i.bf16 %v882_v41, %v885_v46  ;;  %v900_v50 = vmul.f32 %v885_v46, %v885_v46  ;;  %vm890_vm15 = vcmp.gt.f32.partialorder %v885_v46, 0.0  ;;  %888 = vst.msk [vmem:[%s1967_s27 + $0x8] sm:$0xff] %vm659_vm11, %v885_v46 }
 0x1ab   : > { %v894_v51 = vsel %vm890_vm15, %v892_v47, 0.0 }
 0x1ac   : > { %1394 = vrot.lane.b32.xlu0 %v1393_v48, %s1536_s29  ;;  %v1403_v52 = vpack.i.bf16 %v899_v49, %v900_v50  ;;  %896 = vst.msk [vmem:[%s1971_s28 + $0x8] sm:$0xff] %vm659_vm11, %v894_v51  ;;  %v898_v53 = vmul.f32 %v894_v51, %v894_v51  ;;  %v902_v55 = vmul.f32 %v894_v51, %v885_v46  ;;  %s1542_s29 = smov 24  }
 0x1ae   : > { %1404 = vrot.lane.b32.xlu1 %v1403_v52, %s1537_s20  ;;  %v1398_v56 = vpack.i.bf16 %v897_v54, %v898_v53  ;;  %v1408_v58 = vpack.i.bf16 %v901_v57, %v902_v55  ;;  %s1543_s20 = smov 116  }
 0x1b4   : > { %1399 = vrot.lane.b32.xlu0 %v1398_v56, %s1538_s21  ;;  %s1454_s21 = scalar_lea.hbm %s2075_s8, 32 }
 0x1b6   : > { %1409 = vrot.lane.b32.xlu1 %v1408_v58, %s1539_s26 }
 0x21e   : > { %v1395_v0 = vpop.permute.xlu0 %1394 }
 0x21f   : > { %v1397_v15 = vunpack.i.h.bf16 %v1395_v0  ;;  %v1396_v16 = vunpack.i.l.bf16 %v1395_v0 }
 0x220   : > { %v1405_v14 = vpop.permute.xlu1 %1404 }
 0x221   : > { %v935_v19 = vsel %vm659_vm11, %v893_v43, %v1397_v15  ;;  %v936_v20 = vsel %vm659_vm11, %v894_v51, %v1396_v16  ;;  %v1407_v21 = vunpack.i.h.bf16 %v1405_v14  ;;  %v1406_v22 = vunpack.i.l.bf16 %v1405_v14 }
 0x226   : > { %v1400_v6 = vpop.permute.xlu0 %1399 }
 0x227   : > { %v1402_v17 = vunpack.i.h.bf16 %v1400_v6  ;;  %v1401_v18 = vunpack.i.l.bf16 %v1400_v6 }
 0x228   : > { %v1410_v23 = vpop.permute.xlu1 %1409 }
 0x229   : > { %v939_v61 = vsel %vm937_vm0, %v936_v20, %v1401_v18  ;;  %v1412_v24 = vunpack.i.h.bf16 %v1410_v23  ;;  %v1411_v4 = vunpack.i.l.bf16 %v1410_v23  ;;  %v938_v25 = vsel %vm937_vm0, %v935_v19, %v1402_v17 }
 0x22a   : > { %v942_v12 = vsel %vm940_vm1, %v939_v61, %v1406_v22  ;;  %v941_v26 = vsel %vm940_vm1, %v938_v25, %v1407_v21 }
 0x22b   : > { %v945_v62 = vsel %vm943_vm2, %v942_v12, %v1411_v4  ;;  %v944_v9 = vsel %vm943_vm2, %v941_v26, %v1412_v24 }
 0x22c   : > { %964 = vmatpush.msra.mxu2 %v945_v62 }
 0x22e   : > { %965 = vmatpush.msra.mxu2 %v944_v9 }
 0x22f   : > { %1302 = vmatmul.msk.f32.vlgmr.msra.gmra.mxu2 %vm659_vm11, %v946_v27 }
 0x2b2   : > { %v967_v30 = vpop.f32.mrf.mxu2 }
 0x2b3   : > { %1303 = vmatmul.msk.f32.vlgmr.msra.gmra.mxu3 %vm980_vm3, %v967_v30 }
 0x336   : > { %v1001_v5 = vpop.f32.mrf.mxu3 }
 0x337   : > { %v1004_v31 = vmul.f32 %v1001_v5, %v1001_v5 }
 0x339   : > { %1011 = vrot.lane.b32.xlu2 %v1004_v31, %s1540_s0 }
 0x341   : > { %1006 = vrot.lane.b32.xlu2 %v1001_v5, %s1541_s25 }
 0x349   : > { %1029 = vrot.lane.b32.xlu2 %v1004_v31, %s1541_s25 }
 0x393   : > { %v1012_v32 = vpop.permute.xlu2 %1011 }
 0x394   : > { %v1014_v11 = vsub.f32 %v1001_v5, %v1012_v32 }
 0x396   : > { %1035 = vrot.lane.b32.xlu0 %v1014_v11, %s1541_s25  ;;  %s1111_s25 = scalar_lea.hbm %s2076_s9, %s1314_s2 }
 0x39b   : > { %v1007_v33 = vpop.permute.xlu2 %1006 }
 0x39c   : > { %v1009_v34 = vmul.f32 %v1007_v33, %v1001_v5 }
 0x39e   : > { %1016 = vrot.lane.b32.xlu1 %v1009_v34, %s1542_s29  ;;  %v1020_v47 = vmul.f32 2.0, %v1009_v34  ;;  %s1095_s29 = sshll.u32 %s1967_s27, 4  ;;  %s1096_s29 = int_to_ptr.vmem [resolvable:$true] %s1095_s29 }
 0x3a0   : > { %v1021_v53 = vadd.f32 0.0001, %v1020_v47 }
 0x3a3   : > { %v1030_v40 = vpop.permute.xlu2 %1029 }
 0x3a4   : > { %v1032_v41 = vadd.f32 %v1030_v40, %v1004_v31 }
 0x3a6   : > { %v1033_v42 = vadd.f32 0.0001, %v1032_v41 }
 0x408   : > { %v1036_v35 = vpop.permute.xlu0 %1035 }
 0x409   : > { %v1038_v36 = vadd.f32 %v1036_v35, %v1014_v11 }
 0x40b   : > { %v1039_v37 = vadd.f32 0.0009, %v1038_v36 }
 0x40d   : > { %1041 = vrot.lane.b32.xlu0 %v1039_v37, %s1543_s20  ;;  %s1097_s20 = sshll.u32 %s1094_s11, 4  ;;  %s1098_s20 = int_to_ptr.hbm [resolvable:$true] %s1097_s20 }
 0x40e   : > { %s1448_s3 = sshra.s32 %s1098_s20, 4  ;;  %s1449_s3 = int_to_ptr.hbm [resolvable:$true] %s1448_s3 }
 0x40f   : > { %s1450_s4 = scalar_lea.hbm %s1449_s3, 16  ;;  %p1455_p3 = scmp.lt.s32.totalorder %s1449_s3, %s2075_s8 }
 0x410   : > { %v1017_v28 = vpop.permute.xlu1 %1016  ;;  %p1451_p0 = scmp.ne.s32.totalorder %s1449_s3, %s1450_s4  ;;  %p1456_p4 = scmp.lt.s32.totalorder %s1454_s21, %s1450_s4 }
 0x411   : > { %v1019_v38 = vsub.f32 %v1001_v5, %v1017_v28 }
 0x412   : > { %p1452_p1 = pnand %p1451_p0, %p1640_p5  ;;  %p1457_p7 = por %p1456_p4, %p1455_p3 }
 0x413   : > { %v1022_v13 = vmul.f32 2.0, %v1019_v38 }
 0x414   : > { %p1453_p2 = pneg %p1452_p1 }
 0x415   : > { %v1023_v39 = vadd.f32 0.0009, %v1022_v13 }
 0x416   : > { %p1458_p8 = pnand %p1457_p7, %p1453_p2 }
 0x417   : > { %1025 = vrot.lane.b32.xlu1 %v1023_v39, %s1544_s1  ;;  %s1075_s1 = scalar_lea.sflag [#allocation3], %s1959_s12 }
 0x47f   : > { %v1042_v43 = vpop.permute.xlu0 %1041 }
 0x480   : > { %v1044_v44 = vmul.f32 %v1042_v43, %v1033_v42 }
 0x482   : > { %1417 = vrcp.f32 %v1044_v44  ;;  %v1056_v49 = vand.u32 2147483648, %v1044_v44  ;;  %v1054_v51 = vand.u32 2147483647, %v1044_v44  ;;  %vm1050_vm4 = vweird.f32 %v1044_v44 }
 0x484   : > { %v1057_v55 = vor.u32 1.1754944e-38, %v1056_v49  ;;  %vm1055_vm6 = vcmp.eq.f32.partialorder %v1054_v51, 8.507059e+37 }
 0x488   : > { %v1418_v45 = vpop.eup %1417 }
 0x489   : > { %v1046_v46 = vmul.f32 %v1418_v45, %v1044_v44  ;;  %vm1051_vm11 = vweird.f32 %v1418_v45  ;;  %v1026_v52 = vpop.permute.xlu1 %1025 }
 0x48a   : > { %vm1052_vm5 = vmor %vm1050_vm4, %vm1051_vm11  ;;  %v1028_v56 = vmul.f32 %v1026_v52, %v1021_v53 }
 0x48b   : > { %v1047_v48 = vsub.f32 1.0, %v1046_v46 }
 0x48d   : > { %v1048_v50 = vmul.f32 %v1418_v45, %v1047_v48 }
 0x48f   : > { %v1049_v54 = vadd.f32 %v1418_v45, %v1048_v50 }
 0x491   : > { %v1053_v57 = vsel %vm1052_vm5, %v1418_v45, %v1049_v54 }
 0x492   : > { %v1058_v58 = vsel %vm1055_vm6, %v1057_v55, %v1053_v57 }
 0x493   : > { %v1059_v59 = vmul.f32 %v1058_v58, %v1028_v56 }
 0x495   : > { %v1061_v60 = vsel %vm1060_vm7, %v1059_v59, 0.0 }
 0x496   : > { %1062 = vadd.xlane.f32.xlu2 %v1061_v60 }
 0x497   : > { %1461 = shalt.err (!%p1458_p8)
}
 0x498   : > { %s1545_s27 = smov 128   ;;  %s1546_s2 = smov 8  }
 0x499   : > { %1330 = dma.vmem_to_hbm [thread:$0]  (%p1640_p5), %s1096_s29, 256, %s1098_s20, %s1075_s1, %s1545_s27, %s1545_s27, %s1546_s2  }
 0x49a   : > { %s1112_s11 = sshll.u32 %s1971_s28, 4  ;;  %s1114_s18 = sshll.u32 %s1111_s25, 4  ;;  %s1113_s11 = int_to_ptr.vmem [resolvable:$true] %s1112_s11  ;;  %s1115_s18 = int_to_ptr.hbm [resolvable:$true] %s1114_s18 }
 0x49b   : > { %s1080_s5 = scalar_lea.sflag [#allocation7], %s1959_s12  ;;  %s1476_s0 = sshra.s32 %s1115_s18, 4  ;;  %s1477_s0 = int_to_ptr.hbm [resolvable:$true] %s1476_s0 }
 0x49c   : > { %s1478_s3 = scalar_lea.hbm %s1477_s0, 16  ;;  %s1482_s17 = scalar_lea.hbm %s2076_s9, 32 }
 0x49d   : > { %p1479_p9 = scmp.ne.s32.totalorder %s1477_s0, %s1478_s3  ;;  %p1483_p12 = scmp.lt.s32.totalorder %s1477_s0, %s2076_s9 }
 0x49e   : > { %p1484_p13 = scmp.lt.s32.totalorder %s1482_s17, %s1478_s3 }
 0x49f   : > { %p1480_p10 = pnand %p1479_p9, %p1640_p5 }
 0x4a0   : > { %p1485_p0 = por %p1484_p13, %p1483_p12 }
 0x4a1   : > { %p1481_p11 = pneg %p1480_p10 }
 0x4a3   : > { %p1486_p1 = pnand %p1485_p0, %p1481_p11 }
 0x4a5   : > { %1489 = shalt.err (!%p1486_p1)
}
 0x4a6   : > { %1331 = dma.vmem_to_hbm [thread:$0]  (%p1640_p5), %s1113_s11, 256, %s1115_s18, %s1080_s5, %s1545_s27, %s1545_s27, %s1546_s2   ;;  %vm1072_vm8 = vcmask 0  }
 0x4a7   : > { %s427_s25 = scalar_lea.vmem %s2077_s10, %s1659_s30 }
 0x509   : > { %v1063_v1 = vpop.xlane.xlu2 %1062 }
 0x50a   : > { %v1064_v2 = vrot.slane %v1063_v1, 4 }
 0x50c   : > { %v1065_v63 = vadd.f32 %v1064_v2, %v1063_v1 }
 0x50e   : > { %v1066_v3 = vrot.slane %v1065_v63, 2 }
 0x510   : > { %v1067_v7 = vadd.f32 %v1066_v3, %v1065_v63 }
 0x512   : > { %v1068_v8 = vrot.slane %v1067_v7, 1 }
 0x514   : > { %v1069_v10 = vadd.f32 %v1068_v8, %v1067_v7 }
 0x516   : > { %1324 = vpush %v1069_v10 }
 0x547   : > { %s1325_s29 = spop %1324 }
 0x548   : > { %v1071_v0 = vstv %s1325_s29 }
 0x549   : > { %1073 = vst.msk [vmem:[%s427_s25] sm:$0x1] %vm1072_vm8, %v1071_v0 }
 0x54a PF: > { %p1347_p5 = scmp.ge.s32.totalorder %s1532_s16, 2  ;;  %s1132_s23 = sand.u32 1, %s1520_s13  }
 0x54b   : > { %s1133_s20 = scalar_lea.sflag [#allocation3], %s1132_s23 }
 0x54c   : > { %p1339_p2 = pnand %p1347_p5, %p1644_p6 }
 0x54e   : > { %p1340_p3 = pneg %p1339_p2 }
 0x550   : > { %1511 = dma.done.wait (%p1340_p3), %s1133_s20, 256  }
 0x551   : > { %1513 = vsyncadd (%p1340_p3), %s1133_s20, 4294967040  ;;  %s1143_s1 = scalar_lea.sflag [#allocation7], %s1132_s23 }
 0x552   : > { %1515 = dma.done.wait (%p1340_p3), %s1143_s1, 256  }
 0x553   : > { %1517 = vsyncadd (%p1340_p3), %s1143_s1, 4294967040  ;;  %p25_p4 = scmp.ge.s32.totalorder %s1627_s19, 4   ;;  %s2110_s13 = smov %s1524_s14 }
 0x554   : > { %s2111_s14 = smov %s1528_s15  ;;  %s2112_s15 = smov %s1638_s22 }
 0x555   : > { %s2113_s16 = smov %s1627_s19  ;;  %27 = sbr.rel (!%p25_p4) target bundleno = 14 (0xe), region = 127 }
 0x55a   :  { %1155 = vsyncpa [#allocation3], 1 }
 0x55b   :  { %1157 = vsyncpa [#allocation3 + $0x1], 1 }
 0x55c   :  { %1158 = vsyncpa [#allocation7], 1 }
 0x55d   :  { %1160 = vsyncpa [#allocation7 + $0x1], 1 }
 0x55e   :  { %1161 = vsyncpa [#allocation4], 1 }
 0x55f   :  { %1163 = vsyncpa [#allocation4 + $0x1], 1 }

</bundles_post_ra>
